<compile_context>
chip_gen: v5e
topology: v5e:2x2
jax: 0.10.0
libtpu: 0.0.40
codegen_flags: <defaults>
</compile_context>

<pallas_src>
import math

import jax
import jax.numpy as jnp
import numpy as np
from jax.experimental import pallas as pl
from jax.experimental.pallas import tpu as pltpu


# --------------------------------- kernel ------------------------------------

def _make_kernel(deepness, hidden, out_dim):
    H = hidden

    def seg_ln_lrelu(z, aff, n_groups):
        # z:   [B, n_groups*H]  pre-bias linear output
        # aff: [3, n_groups*H]  stacked (bias, gamma, beta) rows
        # Segmented LayerNorm: each contiguous group of H lanes is normalized
        # independently (== n_groups independent nn.LayerNorm(H) modules).
        y = z + aff[0:1, :]
        parts = []
        for g in range(n_groups):
            seg = y[:, g * H:(g + 1) * H]
            mean = jnp.mean(seg, axis=-1, keepdims=True)
            var = jnp.mean(jnp.square(seg - mean), axis=-1, keepdims=True)
            parts.append((seg - mean) * jax.lax.rsqrt(var + 1e-5))
        yn = jnp.concatenate(parts, axis=-1) if n_groups > 1 else parts[0]
        y = yn * aff[1:2, :] + aff[2:3, :]
        return jnp.where(y >= 0, y, 0.01 * y)          # LeakyReLU(0.01)

    def kernel(x0_ref, enc_w0_ref, enc_wr_ref, enc_aff_ref,
               dec_w0_ref, dec_wr_ref, dec_aff_ref,
               head_w_ref, head_b_ref, out_ref):
        # ---- fused f/l/z encoders (block-diagonal weights, 3*H lanes) ----
        h = jnp.dot(x0_ref[...], enc_w0_ref[...],
                    preferred_element_type=jnp.float32)
        h = seg_ln_lrelu(h, enc_aff_ref[0], 3)
        for k in range(1, deepness):
            h = jnp.dot(h, enc_wr_ref[k - 1],
                        preferred_element_type=jnp.float32)
            h = seg_ln_lrelu(h, enc_aff_ref[k], 3)
        # h == torch.cat([f, l, z], dim=-1)

        # ---- fused a/p decoder MLPs (2*H lanes) ----
        d = jnp.dot(h, dec_w0_ref[...], preferred_element_type=jnp.float32)
        d = seg_ln_lrelu(d, dec_aff_ref[0], 2)
        for k in range(1, deepness):
            d = jnp.dot(d, dec_wr_ref[k - 1],
                        preferred_element_type=jnp.float32)
            d = seg_ln_lrelu(d, dec_aff_ref[k], 2)
        # d == [a_decoder_1(latent) | p_decoder_1(latent)]

        # ---- fused heads + sigmoid / cos / sin, lane-dense output ----
        logits = (jnp.dot(d, head_w_ref[...],
                          preferred_element_type=jnp.float32)
                  + head_b_ref[...])
        s = jax.nn.sigmoid(logits)                      # [B, 2*out_dim]
        a = s[:, :out_dim]
        p = 2.0 * jnp.pi * s[:, out_dim:]
        out_ref[...] = jnp.concatenate([a * jnp.cos(p), a * jnp.sin(p)], axis=-1)

    return kernel


# ------------------------------ wrapper / glue --------------------------------

def ddsp_textenv_mlp_forward(spectral_centroid, loudness, input_ds, packed,
                             deepness, hidden, out_dim):
    B = spectral_centroid.shape[0]
    B_pad = -(-B // 8) * 8                              # pad batch to sublane multiple
    x0 = jnp.concatenate(
        [spectral_centroid, loudness, input_ds], axis=-1).astype(jnp.float32)
    if B_pad != B:
        x0 = jnp.pad(x0, ((0, B_pad - B), (0, 0)))

    inputs = [x0] + list(packed)
    out = pl.pallas_call(
        _make_kernel(deepness, hidden, out_dim),
        out_shape=jax.ShapeDtypeStruct((B_pad, 2 * out_dim), jnp.float32),
        in_specs=[pl.BlockSpec(memory_space=pltpu.MemorySpace.VMEM)] * len(inputs),
        out_specs=pl.BlockSpec(memory_space=pltpu.MemorySpace.VMEM),
    )(*inputs)
    real = out[:B, :out_dim]
    imag = out[:B, out_dim:]
    return real, imag


# ---------------------------- deterministic init ------------------------------

def _init_linear(key, fan_in, fan_out):
    # PyTorch nn.Linear default init: U(-1/sqrt(fan_in), 1/sqrt(fan_in)).
    k1, k2 = jax.random.split(key)
    bound = 1.0 / math.sqrt(fan_in)
    W = jax.random.uniform(k1, (fan_in, fan_out), jnp.float32, -bound, bound)
    b = jax.random.uniform(k2, (fan_out,), jnp.float32, -bound, bound)
    return W, b


def build_module_params(key, input_size, hidden, n_filter_bank, deepness, out_dim):
    """Per-layer params mirroring the PyTorch module structure."""
    n_linears = 5 * deepness + 2
    keys = iter(jax.random.split(key, n_linears))

    def mlp_layers(in_size):
        layers, c = [], in_size
        for _ in range(deepness):
            W, b = _init_linear(next(keys), c, hidden)
            layers.append(dict(W=W, b=b,
                               gamma=jnp.ones((hidden,), jnp.float32),
                               beta=jnp.zeros((hidden,), jnp.float32)))
            c = hidden
        return layers

    f_enc = mlp_layers(1)
    l_enc = mlp_layers(n_filter_bank)
    z_enc = mlp_layers(input_size)
    a_dec1 = mlp_layers(3 * hidden)
    Wa, ba = _init_linear(next(keys), hidden, out_dim)
    a_dec2 = dict(W=Wa, b=ba)
    p_dec1 = mlp_layers(3 * hidden)
    Wp, bp = _init_linear(next(keys), hidden, out_dim)
    p_dec2 = dict(W=Wp, b=bp)
    return (f_enc, l_enc, z_enc, a_dec1, a_dec2, p_dec1, p_dec2)


# ------------------------------ parameter packing ------------------------------

def pack_params(modules, hidden, deepness):
    """Pack per-layer params into 8 fused tensors for the kernel."""
    f_enc, l_enc, z_enc, a_dec1, a_dec2, p_dec1, p_dec2 = modules
    H = hidden
    H3, H2 = 3 * H, 2 * H

    def block_diag(mats):
        rows = sum(m.shape[0] for m in mats)
        cols = sum(m.shape[1] for m in mats)
        out = jnp.zeros((rows, cols), jnp.float32)
        r = c = 0
        for m in mats:
            out = out.at[r:r + m.shape[0], c:c + m.shape[1]].set(m)
            r += m.shape[0]
            c += m.shape[1]
        return out

    def stack_aff(branches):
        # [deepness, 3, width]: per layer the (bias, gamma, beta) rows, each the
        # concatenation over branches.
        affs = []
        for k in range(deepness):
            b = jnp.concatenate([br[k]['b'] for br in branches])
            g = jnp.concatenate([br[k]['gamma'] for br in branches])
            be = jnp.concatenate([br[k]['beta'] for br in branches])
            affs.append(jnp.stack([b, g, be]))
        return jnp.stack(affs)

    enc_w0 = block_diag([f_enc[0]['W'], l_enc[0]['W'], z_enc[0]['W']])
    if deepness > 1:
        enc_wr = jnp.stack([block_diag([f_enc[k]['W'], l_enc[k]['W'], z_enc[k]['W']])
                            for k in range(1, deepness)])
    else:
        enc_wr = jnp.zeros((1, H3, H3), jnp.float32)    # dummy, never read
    enc_aff = stack_aff([f_enc, l_enc, z_enc])

    dec_w0 = jnp.concatenate([a_dec1[0]['W'], p_dec1[0]['W']], axis=1)
    if deepness > 1:
        dec_wr = jnp.stack([block_diag([a_dec1[k]['W'], p_dec1[k]['W']])
                            for k in range(1, deepness)])
    else:
        dec_wr = jnp.zeros((1, H2, H2), jnp.float32)    # dummy, never read
    dec_aff = stack_aff([a_dec1, p_dec1])

    head_w = block_diag([a_dec2['W'], p_dec2['W']])
    head_b = jnp.concatenate([a_dec2['b'], p_dec2['b']]).reshape(1, -1)

    return [enc_w0, enc_wr, enc_aff, dec_w0, dec_wr, dec_aff, head_w, head_b]


# ------------------------------ pure-JAX reference ----------------------------

def _reference_forward(sc, ld, zin, modules, deepness):
    f_enc, l_enc, z_enc, a_dec1, a_dec2, p_dec1, p_dec2 = modules

    def run_mlp(x, layers):
        for lay in layers:
            y = x @ lay['W'] + lay['b']
            mean = jnp.mean(y, axis=-1, keepdims=True)
            var = jnp.mean(jnp.square(y - mean), axis=-1, keepdims=True)
            y = (y - mean) / jnp.sqrt(var + 1e-5) * lay['gamma'] + lay['beta']
            x = jnp.where(y >= 0, y, 0.01 * y)
        return x

    latent = jnp.concatenate(
        [run_mlp(sc, f_enc), run_mlp(ld, l_enc), run_mlp(zin, z_enc)], axis=-1)
    a = jax.nn.sigmoid(run_mlp(latent, a_dec1) @ a_dec2['W'] + a_dec2['b'])
    p = 2.0 * jnp.pi * jax.nn.sigmoid(
        run_mlp(latent, p_dec1) @ p_dec2['W'] + p_dec2['b'])
    return a * jnp.cos(p), a * jnp.sin(p)


# ----------------------------------- main -------------------------------------

if __name__ == "__main__":
    # Module hyperparameters (small, consistent with the PyTorch __init__).
    input_size = 8
    hidden_size = 32
    N_filter_bank = 4
    deepness = 2
    compression = 2
    frame_size = 256
    param_per_env = frame_size // (2 * N_filter_bank * compression)   # 16
    out_dim = N_filter_bank * param_per_env                           # 64
    B = 2

    key = jax.random.PRNGKey(0)
    k_sc, k_ld, k_z, k_params = jax.random.split(key, 4)

    spectral_centroid = jax.random.normal(k_sc, (B, 1), jnp.float32)
    loudness = jax.random.normal(k_ld, (B, N_filter_bank), jnp.float32)
    input_ds = jax.random.normal(k_z, (B, input_size), jnp.float32)

    modules = build_module_params(k_params, input_size, hidden_size,
                                  N_filter_bank, deepness, out_dim)
    packed = pack_params(modules, hidden_size, deepness)

    real_param, imag_param = ddsp_textenv_mlp_forward(
        spectral_centroid, loudness, input_ds, packed,
        deepness, hidden_size, out_dim)
    jax.block_until_ready((real_param, imag_param))

    # Sanity check against a pure-JAX reference of the PyTorch forward.
    real_ref, imag_ref = _reference_forward(
        spectral_centroid, loudness, input_ds, modules, deepness)
    np.testing.assert_allclose(np.asarray(real_param), np.asarray(real_ref),
                               rtol=1e-3, atol=1e-4)
    np.testing.assert_allclose(np.asarray(imag_param), np.asarray(imag_ref),
                               rtol=1e-3, atol=1e-4)

    print("KERNEL_OK")
</pallas_src>

<mosaic_0001>
module attributes {stable_mosaic.version = 11 : i64} {
  func.func @kernel(%arg0: memref<8x13xf32, #tpu.memory_space<vmem>>, %arg1: memref<13x96xf32, #tpu.memory_space<vmem>>, %arg2: memref<1x96x96xf32, #tpu.memory_space<vmem>>, %arg3: memref<2x3x96xf32, #tpu.memory_space<vmem>>, %arg4: memref<96x64xf32, #tpu.memory_space<vmem>>, %arg5: memref<1x64x64xf32, #tpu.memory_space<vmem>>, %arg6: memref<2x3x64xf32, #tpu.memory_space<vmem>>, %arg7: memref<64x128xf32, #tpu.memory_space<vmem>>, %arg8: memref<1x128xf32, #tpu.memory_space<vmem>>, %arg9: memref<8x128xf32, #tpu.memory_space<vmem>>) attributes {dimension_semantics = [], scalar_prefetch = 0 : i64, scratch_operands = 0 : i64, tpu.core_type = #tpu.core_type<tc>} {
    %c0 = arith.constant 0 : index
    %c0_0 = arith.constant 0 : index
    %0 = vector.load %arg0[%c0, %c0_0] : memref<8x13xf32, #tpu.memory_space<vmem>>, vector<8x13xf32>
    %c0_1 = arith.constant 0 : index
    %c0_2 = arith.constant 0 : index
    %1 = vector.load %arg1[%c0_1, %c0_2] : memref<13x96xf32, #tpu.memory_space<vmem>>, vector<13x96xf32>
    %cst = arith.constant dense<0.000000e+00> : vector<8x96xf32>
    %2 = tpu.matmul %0, %1, %cst {dimension_numbers = #tpu.dot_dimension_numbers<[1], [0], [0], [1], [0, 0, 1, 1], [], []>} : vector<8x13xf32>, vector<13x96xf32>, vector<8x96xf32> -> vector<8x96xf32>
    %c0_3 = arith.constant 0 : index
    %c0_4 = arith.constant 0 : index
    %c0_5 = arith.constant 0 : index
    %3 = vector.load %arg3[%c0_3, %c0_4, %c0_5] : memref<2x3x96xf32, #tpu.memory_space<vmem>>, vector<1x3x96xf32>
    %4 = vector.shape_cast %3 : vector<1x3x96xf32> to vector<3x96xf32>
    %5 = vector.extract_strided_slice %4 {offsets = [0, 0], sizes = [1, 96], strides = [1, 1]} : vector<3x96xf32> to vector<1x96xf32>
    %6 = vector.broadcast %5 : vector<1x96xf32> to vector<8x96xf32>
    %7 = arith.addf %2, %6 : vector<8x96xf32>
    %8 = vector.extract_strided_slice %7 {offsets = [0, 0], sizes = [8, 32], strides = [1, 1]} : vector<8x96xf32> to vector<8x32xf32>
    %cst_6 = arith.constant dense<0.000000e+00> : vector<8xf32>
    %9 = vector.multi_reduction <add>, %8, %cst_6 [1] : vector<8x32xf32> to vector<8xf32>
    %10 = vector.shape_cast %9 : vector<8xf32> to vector<8x1xf32>
    %cst_7 = arith.constant 3.200000e+01 : f32
    %11 = vector.broadcast %cst_7 : f32 to vector<8x1xf32>
    %12 = arith.divf %10, %11 : vector<8x1xf32>
    %13 = vector.broadcast %12 : vector<8x1xf32> to vector<8x32xf32>
    %14 = arith.subf %8, %13 : vector<8x32xf32>
    %15 = arith.mulf %14, %14 : vector<8x32xf32>
    %cst_8 = arith.constant dense<0.000000e+00> : vector<8xf32>
    %16 = vector.multi_reduction <add>, %15, %cst_8 [1] : vector<8x32xf32> to vector<8xf32>
    %17 = vector.shape_cast %16 : vector<8xf32> to vector<8x1xf32>
    %cst_9 = arith.constant 3.200000e+01 : f32
    %18 = vector.broadcast %cst_9 : f32 to vector<8x1xf32>
    %19 = arith.divf %17, %18 : vector<8x1xf32>
    %20 = vector.broadcast %12 : vector<8x1xf32> to vector<8x32xf32>
    %21 = arith.subf %8, %20 : vector<8x32xf32>
    %cst_10 = arith.constant 9.99999974E-6 : f32
    %22 = vector.broadcast %cst_10 : f32 to vector<8x1xf32>
    %23 = arith.addf %19, %22 : vector<8x1xf32>
    %24 = math.rsqrt %23 : vector<8x1xf32>
    %25 = vector.broadcast %24 : vector<8x1xf32> to vector<8x32xf32>
    %26 = arith.mulf %21, %25 : vector<8x32xf32>
    %27 = vector.extract_strided_slice %7 {offsets = [0, 32], sizes = [8, 32], strides = [1, 1]} : vector<8x96xf32> to vector<8x32xf32>
    %cst_11 = arith.constant dense<0.000000e+00> : vector<8xf32>
    %28 = vector.multi_reduction <add>, %27, %cst_11 [1] : vector<8x32xf32> to vector<8xf32>
    %29 = vector.shape_cast %28 : vector<8xf32> to vector<8x1xf32>
    %cst_12 = arith.constant 3.200000e+01 : f32
    %30 = vector.broadcast %cst_12 : f32 to vector<8x1xf32>
    %31 = arith.divf %29, %30 : vector<8x1xf32>
    %32 = vector.broadcast %31 : vector<8x1xf32> to vector<8x32xf32>
    %33 = arith.subf %27, %32 : vector<8x32xf32>
    %34 = arith.mulf %33, %33 : vector<8x32xf32>
    %cst_13 = arith.constant dense<0.000000e+00> : vector<8xf32>
    %35 = vector.multi_reduction <add>, %34, %cst_13 [1] : vector<8x32xf32> to vector<8xf32>
    %36 = vector.shape_cast %35 : vector<8xf32> to vector<8x1xf32>
    %cst_14 = arith.constant 3.200000e+01 : f32
    %37 = vector.broadcast %cst_14 : f32 to vector<8x1xf32>
    %38 = arith.divf %36, %37 : vector<8x1xf32>
    %39 = vector.broadcast %31 : vector<8x1xf32> to vector<8x32xf32>
    %40 = arith.subf %27, %39 : vector<8x32xf32>
    %cst_15 = arith.constant 9.99999974E-6 : f32
    %41 = vector.broadcast %cst_15 : f32 to vector<8x1xf32>
    %42 = arith.addf %38, %41 : vector<8x1xf32>
    %43 = math.rsqrt %42 : vector<8x1xf32>
    %44 = vector.broadcast %43 : vector<8x1xf32> to vector<8x32xf32>
    %45 = arith.mulf %40, %44 : vector<8x32xf32>
    %46 = vector.extract_strided_slice %7 {offsets = [0, 64], sizes = [8, 32], strides = [1, 1]} : vector<8x96xf32> to vector<8x32xf32>
    %cst_16 = arith.constant dense<0.000000e+00> : vector<8xf32>
    %47 = vector.multi_reduction <add>, %46, %cst_16 [1] : vector<8x32xf32> to vector<8xf32>
    %48 = vector.shape_cast %47 : vector<8xf32> to vector<8x1xf32>
    %cst_17 = arith.constant 3.200000e+01 : f32
    %49 = vector.broadcast %cst_17 : f32 to vector<8x1xf32>
    %50 = arith.divf %48, %49 : vector<8x1xf32>
    %51 = vector.broadcast %50 : vector<8x1xf32> to vector<8x32xf32>
    %52 = arith.subf %46, %51 : vector<8x32xf32>
    %53 = arith.mulf %52, %52 : vector<8x32xf32>
    %cst_18 = arith.constant dense<0.000000e+00> : vector<8xf32>
    %54 = vector.multi_reduction <add>, %53, %cst_18 [1] : vector<8x32xf32> to vector<8xf32>
    %55 = vector.shape_cast %54 : vector<8xf32> to vector<8x1xf32>
    %cst_19 = arith.constant 3.200000e+01 : f32
    %56 = vector.broadcast %cst_19 : f32 to vector<8x1xf32>
    %57 = arith.divf %55, %56 : vector<8x1xf32>
    %58 = vector.broadcast %50 : vector<8x1xf32> to vector<8x32xf32>
    %59 = arith.subf %46, %58 : vector<8x32xf32>
    %cst_20 = arith.constant 9.99999974E-6 : f32
    %60 = vector.broadcast %cst_20 : f32 to vector<8x1xf32>
    %61 = arith.addf %57, %60 : vector<8x1xf32>
    %62 = math.rsqrt %61 : vector<8x1xf32>
    %63 = vector.broadcast %62 : vector<8x1xf32> to vector<8x32xf32>
    %64 = arith.mulf %59, %63 : vector<8x32xf32>
    %65 = tpu.concatenate %26, %45, %64 in 1 : vector<8x32xf32>, vector<8x32xf32>, vector<8x32xf32> -> vector<8x96xf32>
    %66 = vector.extract_strided_slice %4 {offsets = [1, 0], sizes = [1, 96], strides = [1, 1]} : vector<3x96xf32> to vector<1x96xf32>
    %67 = vector.broadcast %66 : vector<1x96xf32> to vector<8x96xf32>
    %68 = arith.mulf %65, %67 : vector<8x96xf32>
    %69 = vector.extract_strided_slice %4 {offsets = [2, 0], sizes = [1, 96], strides = [1, 1]} : vector<3x96xf32> to vector<1x96xf32>
    %70 = vector.broadcast %69 : vector<1x96xf32> to vector<8x96xf32>
    %71 = arith.addf %68, %70 : vector<8x96xf32>
    %cst_21 = arith.constant 0.000000e+00 : f32
    %72 = vector.broadcast %cst_21 : f32 to vector<8x96xf32>
    %73 = arith.cmpf oge, %71, %72 : vector<8x96xf32>
    %cst_22 = arith.constant 0.00999999977 : f32
    %74 = vector.broadcast %cst_22 : f32 to vector<8x96xf32>
    %75 = arith.mulf %74, %71 : vector<8x96xf32>
    %76 = arith.select %73, %71, %75 : vector<8x96xi1>, vector<8x96xf32>
    %c0_23 = arith.constant 0 : index
    %c0_24 = arith.constant 0 : index
    %c0_25 = arith.constant 0 : index
    %77 = vector.load %arg2[%c0_23, %c0_24, %c0_25] : memref<1x96x96xf32, #tpu.memory_space<vmem>>, vector<1x96x96xf32>
    %78 = vector.shape_cast %77 : vector<1x96x96xf32> to vector<96x96xf32>
    %cst_26 = arith.constant dense<0.000000e+00> : vector<8x96xf32>
    %79 = tpu.matmul %76, %78, %cst_26 {dimension_numbers = #tpu.dot_dimension_numbers<[1], [0], [0], [1], [0, 0, 1, 1], [], []>} : vector<8x96xf32>, vector<96x96xf32>, vector<8x96xf32> -> vector<8x96xf32>
    %c1 = arith.constant 1 : index
    %c0_27 = arith.constant 0 : index
    %c0_28 = arith.constant 0 : index
    %80 = vector.load %arg3[%c1, %c0_27, %c0_28] : memref<2x3x96xf32, #tpu.memory_space<vmem>>, vector<1x3x96xf32>
    %81 = vector.shape_cast %80 : vector<1x3x96xf32> to vector<3x96xf32>
    %82 = vector.extract_strided_slice %81 {offsets = [0, 0], sizes = [1, 96], strides = [1, 1]} : vector<3x96xf32> to vector<1x96xf32>
    %83 = vector.broadcast %82 : vector<1x96xf32> to vector<8x96xf32>
    %84 = arith.addf %79, %83 : vector<8x96xf32>
    %85 = vector.extract_strided_slice %84 {offsets = [0, 0], sizes = [8, 32], strides = [1, 1]} : vector<8x96xf32> to vector<8x32xf32>
    %cst_29 = arith.constant dense<0.000000e+00> : vector<8xf32>
    %86 = vector.multi_reduction <add>, %85, %cst_29 [1] : vector<8x32xf32> to vector<8xf32>
    %87 = vector.shape_cast %86 : vector<8xf32> to vector<8x1xf32>
    %cst_30 = arith.constant 3.200000e+01 : f32
    %88 = vector.broadcast %cst_30 : f32 to vector<8x1xf32>
    %89 = arith.divf %87, %88 : vector<8x1xf32>
    %90 = vector.broadcast %89 : vector<8x1xf32> to vector<8x32xf32>
    %91 = arith.subf %85, %90 : vector<8x32xf32>
    %92 = arith.mulf %91, %91 : vector<8x32xf32>
    %cst_31 = arith.constant dense<0.000000e+00> : vector<8xf32>
    %93 = vector.multi_reduction <add>, %92, %cst_31 [1] : vector<8x32xf32> to vector<8xf32>
    %94 = vector.shape_cast %93 : vector<8xf32> to vector<8x1xf32>
    %cst_32 = arith.constant 3.200000e+01 : f32
    %95 = vector.broadcast %cst_32 : f32 to vector<8x1xf32>
    %96 = arith.divf %94, %95 : vector<8x1xf32>
    %97 = vector.broadcast %89 : vector<8x1xf32> to vector<8x32xf32>
    %98 = arith.subf %85, %97 : vector<8x32xf32>
    %cst_33 = arith.constant 9.99999974E-6 : f32
    %99 = vector.broadcast %cst_33 : f32 to vector<8x1xf32>
    %100 = arith.addf %96, %99 : vector<8x1xf32>
    %101 = math.rsqrt %100 : vector<8x1xf32>
    %102 = vector.broadcast %101 : vector<8x1xf32> to vector<8x32xf32>
    %103 = arith.mulf %98, %102 : vector<8x32xf32>
    %104 = vector.extract_strided_slice %84 {offsets = [0, 32], sizes = [8, 32], strides = [1, 1]} : vector<8x96xf32> to vector<8x32xf32>
    %cst_34 = arith.constant dense<0.000000e+00> : vector<8xf32>
    %105 = vector.multi_reduction <add>, %104, %cst_34 [1] : vector<8x32xf32> to vector<8xf32>
    %106 = vector.shape_cast %105 : vector<8xf32> to vector<8x1xf32>
    %cst_35 = arith.constant 3.200000e+01 : f32
    %107 = vector.broadcast %cst_35 : f32 to vector<8x1xf32>
    %108 = arith.divf %106, %107 : vector<8x1xf32>
    %109 = vector.broadcast %108 : vector<8x1xf32> to vector<8x32xf32>
    %110 = arith.subf %104, %109 : vector<8x32xf32>
    %111 = arith.mulf %110, %110 : vector<8x32xf32>
    %cst_36 = arith.constant dense<0.000000e+00> : vector<8xf32>
    %112 = vector.multi_reduction <add>, %111, %cst_36 [1] : vector<8x32xf32> to vector<8xf32>
    %113 = vector.shape_cast %112 : vector<8xf32> to vector<8x1xf32>
    %cst_37 = arith.constant 3.200000e+01 : f32
    %114 = vector.broadcast %cst_37 : f32 to vector<8x1xf32>
    %115 = arith.divf %113, %114 : vector<8x1xf32>
    %116 = vector.broadcast %108 : vector<8x1xf32> to vector<8x32xf32>
    %117 = arith.subf %104, %116 : vector<8x32xf32>
    %cst_38 = arith.constant 9.99999974E-6 : f32
    %118 = vector.broadcast %cst_38 : f32 to vector<8x1xf32>
    %119 = arith.addf %115, %118 : vector<8x1xf32>
    %120 = math.rsqrt %119 : vector<8x1xf32>
    %121 = vector.broadcast %120 : vector<8x1xf32> to vector<8x32xf32>
    %122 = arith.mulf %117, %121 : vector<8x32xf32>
    %123 = vector.extract_strided_slice %84 {offsets = [0, 64], sizes = [8, 32], strides = [1, 1]} : vector<8x96xf32> to vector<8x32xf32>
    %cst_39 = arith.constant dense<0.000000e+00> : vector<8xf32>
    %124 = vector.multi_reduction <add>, %123, %cst_39 [1] : vector<8x32xf32> to vector<8xf32>
    %125 = vector.shape_cast %124 : vector<8xf32> to vector<8x1xf32>
    %cst_40 = arith.constant 3.200000e+01 : f32
    %126 = vector.broadcast %cst_40 : f32 to vector<8x1xf32>
    %127 = arith.divf %125, %126 : vector<8x1xf32>
    %128 = vector.broadcast %127 : vector<8x1xf32> to vector<8x32xf32>
    %129 = arith.subf %123, %128 : vector<8x32xf32>
    %130 = arith.mulf %129, %129 : vector<8x32xf32>
    %cst_41 = arith.constant dense<0.000000e+00> : vector<8xf32>
    %131 = vector.multi_reduction <add>, %130, %cst_41 [1] : vector<8x32xf32> to vector<8xf32>
    %132 = vector.shape_cast %131 : vector<8xf32> to vector<8x1xf32>
    %cst_42 = arith.constant 3.200000e+01 : f32
    %133 = vector.broadcast %cst_42 : f32 to vector<8x1xf32>
    %134 = arith.divf %132, %133 : vector<8x1xf32>
    %135 = vector.broadcast %127 : vector<8x1xf32> to vector<8x32xf32>
    %136 = arith.subf %123, %135 : vector<8x32xf32>
    %cst_43 = arith.constant 9.99999974E-6 : f32
    %137 = vector.broadcast %cst_43 : f32 to vector<8x1xf32>
    %138 = arith.addf %134, %137 : vector<8x1xf32>
    %139 = math.rsqrt %138 : vector<8x1xf32>
    %140 = vector.broadcast %139 : vector<8x1xf32> to vector<8x32xf32>
    %141 = arith.mulf %136, %140 : vector<8x32xf32>
    %142 = tpu.concatenate %103, %122, %141 in 1 : vector<8x32xf32>, vector<8x32xf32>, vector<8x32xf32> -> vector<8x96xf32>
    %143 = vector.extract_strided_slice %81 {offsets = [1, 0], sizes = [1, 96], strides = [1, 1]} : vector<3x96xf32> to vector<1x96xf32>
    %144 = vector.broadcast %143 : vector<1x96xf32> to vector<8x96xf32>
    %145 = arith.mulf %142, %144 : vector<8x96xf32>
    %146 = vector.extract_strided_slice %81 {offsets = [2, 0], sizes = [1, 96], strides = [1, 1]} : vector<3x96xf32> to vector<1x96xf32>
    %147 = vector.broadcast %146 : vector<1x96xf32> to vector<8x96xf32>
    %148 = arith.addf %145, %147 : vector<8x96xf32>
    %cst_44 = arith.constant 0.000000e+00 : f32
    %149 = vector.broadcast %cst_44 : f32 to vector<8x96xf32>
    %150 = arith.cmpf oge, %148, %149 : vector<8x96xf32>
    %cst_45 = arith.constant 0.00999999977 : f32
    %151 = vector.broadcast %cst_45 : f32 to vector<8x96xf32>
    %152 = arith.mulf %151, %148 : vector<8x96xf32>
    %153 = arith.select %150, %148, %152 : vector<8x96xi1>, vector<8x96xf32>
    %c0_46 = arith.constant 0 : index
    %c0_47 = arith.constant 0 : index
    %154 = vector.load %arg4[%c0_46, %c0_47] : memref<96x64xf32, #tpu.memory_space<vmem>>, vector<96x64xf32>
    %cst_48 = arith.constant dense<0.000000e+00> : vector<8x64xf32>
    %155 = tpu.matmul %153, %154, %cst_48 {dimension_numbers = #tpu.dot_dimension_numbers<[1], [0], [0], [1], [0, 0, 1, 1], [], []>} : vector<8x96xf32>, vector<96x64xf32>, vector<8x64xf32> -> vector<8x64xf32>
    %c0_49 = arith.constant 0 : index
    %c0_50 = arith.constant 0 : index
    %c0_51 = arith.constant 0 : index
    %156 = vector.load %arg6[%c0_49, %c0_50, %c0_51] : memref<2x3x64xf32, #tpu.memory_space<vmem>>, vector<1x3x64xf32>
    %157 = vector.shape_cast %156 : vector<1x3x64xf32> to vector<3x64xf32>
    %158 = vector.extract_strided_slice %157 {offsets = [0, 0], sizes = [1, 64], strides = [1, 1]} : vector<3x64xf32> to vector<1x64xf32>
    %159 = vector.broadcast %158 : vector<1x64xf32> to vector<8x64xf32>
    %160 = arith.addf %155, %159 : vector<8x64xf32>
    %161 = vector.extract_strided_slice %160 {offsets = [0, 0], sizes = [8, 32], strides = [1, 1]} : vector<8x64xf32> to vector<8x32xf32>
    %cst_52 = arith.constant dense<0.000000e+00> : vector<8xf32>
    %162 = vector.multi_reduction <add>, %161, %cst_52 [1] : vector<8x32xf32> to vector<8xf32>
    %163 = vector.shape_cast %162 : vector<8xf32> to vector<8x1xf32>
    %cst_53 = arith.constant 3.200000e+01 : f32
    %164 = vector.broadcast %cst_53 : f32 to vector<8x1xf32>
    %165 = arith.divf %163, %164 : vector<8x1xf32>
    %166 = vector.broadcast %165 : vector<8x1xf32> to vector<8x32xf32>
    %167 = arith.subf %161, %166 : vector<8x32xf32>
    %168 = arith.mulf %167, %167 : vector<8x32xf32>
    %cst_54 = arith.constant dense<0.000000e+00> : vector<8xf32>
    %169 = vector.multi_reduction <add>, %168, %cst_54 [1] : vector<8x32xf32> to vector<8xf32>
    %170 = vector.shape_cast %169 : vector<8xf32> to vector<8x1xf32>
    %cst_55 = arith.constant 3.200000e+01 : f32
    %171 = vector.broadcast %cst_55 : f32 to vector<8x1xf32>
    %172 = arith.divf %170, %171 : vector<8x1xf32>
    %173 = vector.broadcast %165 : vector<8x1xf32> to vector<8x32xf32>
    %174 = arith.subf %161, %173 : vector<8x32xf32>
    %cst_56 = arith.constant 9.99999974E-6 : f32
    %175 = vector.broadcast %cst_56 : f32 to vector<8x1xf32>
    %176 = arith.addf %172, %175 : vector<8x1xf32>
    %177 = math.rsqrt %176 : vector<8x1xf32>
    %178 = vector.broadcast %177 : vector<8x1xf32> to vector<8x32xf32>
    %179 = arith.mulf %174, %178 : vector<8x32xf32>
    %180 = vector.extract_strided_slice %160 {offsets = [0, 32], sizes = [8, 32], strides = [1, 1]} : vector<8x64xf32> to vector<8x32xf32>
    %cst_57 = arith.constant dense<0.000000e+00> : vector<8xf32>
    %181 = vector.multi_reduction <add>, %180, %cst_57 [1] : vector<8x32xf32> to vector<8xf32>
    %182 = vector.shape_cast %181 : vector<8xf32> to vector<8x1xf32>
    %cst_58 = arith.constant 3.200000e+01 : f32
    %183 = vector.broadcast %cst_58 : f32 to vector<8x1xf32>
    %184 = arith.divf %182, %183 : vector<8x1xf32>
    %185 = vector.broadcast %184 : vector<8x1xf32> to vector<8x32xf32>
    %186 = arith.subf %180, %185 : vector<8x32xf32>
    %187 = arith.mulf %186, %186 : vector<8x32xf32>
    %cst_59 = arith.constant dense<0.000000e+00> : vector<8xf32>
    %188 = vector.multi_reduction <add>, %187, %cst_59 [1] : vector<8x32xf32> to vector<8xf32>
    %189 = vector.shape_cast %188 : vector<8xf32> to vector<8x1xf32>
    %cst_60 = arith.constant 3.200000e+01 : f32
    %190 = vector.broadcast %cst_60 : f32 to vector<8x1xf32>
    %191 = arith.divf %189, %190 : vector<8x1xf32>
    %192 = vector.broadcast %184 : vector<8x1xf32> to vector<8x32xf32>
    %193 = arith.subf %180, %192 : vector<8x32xf32>
    %cst_61 = arith.constant 9.99999974E-6 : f32
    %194 = vector.broadcast %cst_61 : f32 to vector<8x1xf32>
    %195 = arith.addf %191, %194 : vector<8x1xf32>
    %196 = math.rsqrt %195 : vector<8x1xf32>
    %197 = vector.broadcast %196 : vector<8x1xf32> to vector<8x32xf32>
    %198 = arith.mulf %193, %197 : vector<8x32xf32>
    %199 = tpu.concatenate %179, %198 in 1 : vector<8x32xf32>, vector<8x32xf32> -> vector<8x64xf32>
    %200 = vector.extract_strided_slice %157 {offsets = [1, 0], sizes = [1, 64], strides = [1, 1]} : vector<3x64xf32> to vector<1x64xf32>
    %201 = vector.broadcast %200 : vector<1x64xf32> to vector<8x64xf32>
    %202 = arith.mulf %199, %201 : vector<8x64xf32>
    %203 = vector.extract_strided_slice %157 {offsets = [2, 0], sizes = [1, 64], strides = [1, 1]} : vector<3x64xf32> to vector<1x64xf32>
    %204 = vector.broadcast %203 : vector<1x64xf32> to vector<8x64xf32>
    %205 = arith.addf %202, %204 : vector<8x64xf32>
    %cst_62 = arith.constant 0.000000e+00 : f32
    %206 = vector.broadcast %cst_62 : f32 to vector<8x64xf32>
    %207 = arith.cmpf oge, %205, %206 : vector<8x64xf32>
    %cst_63 = arith.constant 0.00999999977 : f32
    %208 = vector.broadcast %cst_63 : f32 to vector<8x64xf32>
    %209 = arith.mulf %208, %205 : vector<8x64xf32>
    %210 = arith.select %207, %205, %209 : vector<8x64xi1>, vector<8x64xf32>
    %c0_64 = arith.constant 0 : index
    %c0_65 = arith.constant 0 : index
    %c0_66 = arith.constant 0 : index
    %211 = vector.load %arg5[%c0_64, %c0_65, %c0_66] : memref<1x64x64xf32, #tpu.memory_space<vmem>>, vector<1x64x64xf32>
    %212 = vector.shape_cast %211 : vector<1x64x64xf32> to vector<64x64xf32>
    %cst_67 = arith.constant dense<0.000000e+00> : vector<8x64xf32>
    %213 = tpu.matmul %210, %212, %cst_67 {dimension_numbers = #tpu.dot_dimension_numbers<[1], [0], [0], [1], [0, 0, 1, 1], [], []>} : vector<8x64xf32>, vector<64x64xf32>, vector<8x64xf32> -> vector<8x64xf32>
    %c1_68 = arith.constant 1 : index
    %c0_69 = arith.constant 0 : index
    %c0_70 = arith.constant 0 : index
    %214 = vector.load %arg6[%c1_68, %c0_69, %c0_70] : memref<2x3x64xf32, #tpu.memory_space<vmem>>, vector<1x3x64xf32>
    %215 = vector.shape_cast %214 : vector<1x3x64xf32> to vector<3x64xf32>
    %216 = vector.extract_strided_slice %215 {offsets = [0, 0], sizes = [1, 64], strides = [1, 1]} : vector<3x64xf32> to vector<1x64xf32>
    %217 = vector.broadcast %216 : vector<1x64xf32> to vector<8x64xf32>
    %218 = arith.addf %213, %217 : vector<8x64xf32>
    %219 = vector.extract_strided_slice %218 {offsets = [0, 0], sizes = [8, 32], strides = [1, 1]} : vector<8x64xf32> to vector<8x32xf32>
    %cst_71 = arith.constant dense<0.000000e+00> : vector<8xf32>
    %220 = vector.multi_reduction <add>, %219, %cst_71 [1] : vector<8x32xf32> to vector<8xf32>
    %221 = vector.shape_cast %220 : vector<8xf32> to vector<8x1xf32>
    %cst_72 = arith.constant 3.200000e+01 : f32
    %222 = vector.broadcast %cst_72 : f32 to vector<8x1xf32>
    %223 = arith.divf %221, %222 : vector<8x1xf32>
    %224 = vector.broadcast %223 : vector<8x1xf32> to vector<8x32xf32>
    %225 = arith.subf %219, %224 : vector<8x32xf32>
    %226 = arith.mulf %225, %225 : vector<8x32xf32>
    %cst_73 = arith.constant dense<0.000000e+00> : vector<8xf32>
    %227 = vector.multi_reduction <add>, %226, %cst_73 [1] : vector<8x32xf32> to vector<8xf32>
    %228 = vector.shape_cast %227 : vector<8xf32> to vector<8x1xf32>
    %cst_74 = arith.constant 3.200000e+01 : f32
    %229 = vector.broadcast %cst_74 : f32 to vector<8x1xf32>
    %230 = arith.divf %228, %229 : vector<8x1xf32>
    %231 = vector.broadcast %223 : vector<8x1xf32> to vector<8x32xf32>
    %232 = arith.subf %219, %231 : vector<8x32xf32>
    %cst_75 = arith.constant 9.99999974E-6 : f32
    %233 = vector.broadcast %cst_75 : f32 to vector<8x1xf32>
    %234 = arith.addf %230, %233 : vector<8x1xf32>
    %235 = math.rsqrt %234 : vector<8x1xf32>
    %236 = vector.broadcast %235 : vector<8x1xf32> to vector<8x32xf32>
    %237 = arith.mulf %232, %236 : vector<8x32xf32>
    %238 = vector.extract_strided_slice %218 {offsets = [0, 32], sizes = [8, 32], strides = [1, 1]} : vector<8x64xf32> to vector<8x32xf32>
    %cst_76 = arith.constant dense<0.000000e+00> : vector<8xf32>
    %239 = vector.multi_reduction <add>, %238, %cst_76 [1] : vector<8x32xf32> to vector<8xf32>
    %240 = vector.shape_cast %239 : vector<8xf32> to vector<8x1xf32>
    %cst_77 = arith.constant 3.200000e+01 : f32
    %241 = vector.broadcast %cst_77 : f32 to vector<8x1xf32>
    %242 = arith.divf %240, %241 : vector<8x1xf32>
    %243 = vector.broadcast %242 : vector<8x1xf32> to vector<8x32xf32>
    %244 = arith.subf %238, %243 : vector<8x32xf32>
    %245 = arith.mulf %244, %244 : vector<8x32xf32>
    %cst_78 = arith.constant dense<0.000000e+00> : vector<8xf32>
    %246 = vector.multi_reduction <add>, %245, %cst_78 [1] : vector<8x32xf32> to vector<8xf32>
    %247 = vector.shape_cast %246 : vector<8xf32> to vector<8x1xf32>
    %cst_79 = arith.constant 3.200000e+01 : f32
    %248 = vector.broadcast %cst_79 : f32 to vector<8x1xf32>
    %249 = arith.divf %247, %248 : vector<8x1xf32>
    %250 = vector.broadcast %242 : vector<8x1xf32> to vector<8x32xf32>
    %251 = arith.subf %238, %250 : vector<8x32xf32>
    %cst_80 = arith.constant 9.99999974E-6 : f32
    %252 = vector.broadcast %cst_80 : f32 to vector<8x1xf32>
    %253 = arith.addf %249, %252 : vector<8x1xf32>
    %254 = math.rsqrt %253 : vector<8x1xf32>
    %255 = vector.broadcast %254 : vector<8x1xf32> to vector<8x32xf32>
    %256 = arith.mulf %251, %255 : vector<8x32xf32>
    %257 = tpu.concatenate %237, %256 in 1 : vector<8x32xf32>, vector<8x32xf32> -> vector<8x64xf32>
    %258 = vector.extract_strided_slice %215 {offsets = [1, 0], sizes = [1, 64], strides = [1, 1]} : vector<3x64xf32> to vector<1x64xf32>
    %259 = vector.broadcast %258 : vector<1x64xf32> to vector<8x64xf32>
    %260 = arith.mulf %257, %259 : vector<8x64xf32>
    %261 = vector.extract_strided_slice %215 {offsets = [2, 0], sizes = [1, 64], strides = [1, 1]} : vector<3x64xf32> to vector<1x64xf32>
    %262 = vector.broadcast %261 : vector<1x64xf32> to vector<8x64xf32>
    %263 = arith.addf %260, %262 : vector<8x64xf32>
    %cst_81 = arith.constant 0.000000e+00 : f32
    %264 = vector.broadcast %cst_81 : f32 to vector<8x64xf32>
    %265 = arith.cmpf oge, %263, %264 : vector<8x64xf32>
    %cst_82 = arith.constant 0.00999999977 : f32
    %266 = vector.broadcast %cst_82 : f32 to vector<8x64xf32>
    %267 = arith.mulf %266, %263 : vector<8x64xf32>
    %268 = arith.select %265, %263, %267 : vector<8x64xi1>, vector<8x64xf32>
    %c0_83 = arith.constant 0 : index
    %c0_84 = arith.constant 0 : index
    %269 = vector.load %arg7[%c0_83, %c0_84] : memref<64x128xf32, #tpu.memory_space<vmem>>, vector<64x128xf32>
    %cst_85 = arith.constant dense<0.000000e+00> : vector<8x128xf32>
    %270 = tpu.matmul %268, %269, %cst_85 {dimension_numbers = #tpu.dot_dimension_numbers<[1], [0], [0], [1], [0, 0, 1, 1], [], []>} : vector<8x64xf32>, vector<64x128xf32>, vector<8x128xf32> -> vector<8x128xf32>
    %c0_86 = arith.constant 0 : index
    %c0_87 = arith.constant 0 : index
    %271 = vector.load %arg8[%c0_86, %c0_87] : memref<1x128xf32, #tpu.memory_space<vmem>>, vector<1x128xf32>
    %272 = vector.broadcast %271 : vector<1x128xf32> to vector<8x128xf32>
    %273 = arith.addf %270, %272 : vector<8x128xf32>
    %274 = arith.negf %273 : vector<8x128xf32>
    %275 = math.exp %274 : vector<8x128xf32>
    %cst_88 = arith.constant 1.000000e+00 : f32
    %276 = vector.broadcast %cst_88 : f32 to vector<8x128xf32>
    %277 = arith.addf %276, %275 : vector<8x128xf32>
    %278 = arith.divf %276, %277 : vector<8x128xf32>
    %279 = vector.extract_strided_slice %278 {offsets = [0, 0], sizes = [8, 64], strides = [1, 1]} : vector<8x128xf32> to vector<8x64xf32>
    %280 = vector.extract_strided_slice %278 {offsets = [0, 64], sizes = [8, 64], strides = [1, 1]} : vector<8x128xf32> to vector<8x64xf32>
    %cst_89 = arith.constant 6.28318548 : f32
    %281 = vector.broadcast %cst_89 : f32 to vector<8x64xf32>
    %282 = arith.mulf %281, %280 : vector<8x64xf32>
    %283 = math.cos %282 : vector<8x64xf32>
    %284 = arith.mulf %279, %283 : vector<8x64xf32>
    %285 = math.sin %282 : vector<8x64xf32>
    %286 = arith.mulf %279, %285 : vector<8x64xf32>
    %287 = tpu.concatenate %284, %286 in 1 : vector<8x64xf32>, vector<8x64xf32> -> vector<8x128xf32>
    %c0_90 = arith.constant 0 : index
    %c0_91 = arith.constant 0 : index
    %288 = vector.load %arg9[%c0_90, %c0_91] : memref<8x128xf32, #tpu.memory_space<vmem>>, vector<8x128xf32>
    tpu.vector_store %arg9[%c0_90, %c0_91], %287 {strides = array<i32>} : memref<8x128xf32, #tpu.memory_space<vmem>>, vector<8x128xf32>,
    return
  }
}

</mosaic_0001>

<bundles_post_ra>
// kernel: tpu_custom_call.1
= control target key start
LH: loop header
LB: loop body
LE: loop exit
PB: predicated region body
PF: predicated region fallthrough
CT: control target
= control target key end

     0   :  { %14 = vsyncpa [#allocation3], 0  ;;  %s1418_s0 = inlined_call_operand.hbm [shape: f32[8,13], index: 0, kind: input, shape index: {}]   ;;  %s1419_s1 = inlined_call_operand.vmem [shape: f32[13,96], index: 1, kind: input, shape index: {}]   ;;  %s1420_s2 = inlined_call_operand.vmem [shape: f32[1,96,96], index: 2, kind: input, shape index: {}]   ;;  %s1421_s3 = inlined_call_operand.vmem [shape: f32[2,3,96], index: 3, kind: input, shape index: {}]   ;;  %s1422_s4 = inlined_call_operand.vmem [shape: f32[96,64], index: 4, kind: input, shape index: {}]   ;;  %s1423_s5 = inlined_call_operand.vmem [shape: f32[1,64,64], index: 5, kind: input, shape index: {}]   ;;  %s1424_s6 = inlined_call_operand.vmem [shape: f32[2,3,64], index: 6, kind: input, shape index: {}]   ;;  %s1425_s7 = inlined_call_operand.hbm [shape: f32[64,128], index: 7, kind: input, shape index: {}]   ;;  %s1426_s8 = inlined_call_operand.vmem [shape: f32[1,128], index: 8, kind: input, shape index: {}]   ;;  %s1427_s9 = inlined_call_operand.hbm [shape: f32[8,128], index: 9, kind: output, shape index: {}]  }
   0x1   :  { %15 = vsyncpa [#allocation6], 0 }
   0x2   :  { %16 = vsyncpa [#allocation4], 0  ;;  %s22_s11 = sshll.u32 %s1418_s0, 4  ;;  %s1048_s12 = smov [#allocation2]   ;;  %s23_s11 = int_to_ptr.hbm [resolvable:$true] %s22_s11 }
   0x3   :  { %s24_s13 = sshll.u32 %s1048_s12, 4  ;;  %s44_s16 = sshll.u32 %s1425_s7, 4  ;;  %s25_s13 = int_to_ptr.vmem [resolvable:$true] %s24_s13  ;;  %s45_s16 = int_to_ptr.hbm [resolvable:$true] %s44_s16 }
   0x4   :  { %27 = dma.hbm_to_vmem [thread:$0]  %s23_s11, 128, %s25_s13, [#allocation3]  }
   0x5   :  { %s1049_s17 = smov [#allocation5]   ;;  %s1050_s19 = smov 128  }
   0x6   :  { %s46_s18 = sshll.u32 %s1049_s17, 4  ;;  %s1051_s20 = smov 8   ;;  %s47_s18 = int_to_ptr.vmem [resolvable:$true] %s46_s18 }
   0x7   :  { %52 = dma.hbm_to_vmem [thread:$0]  %s45_s16, 1024, %s47_s18, [#allocation6], %s1050_s19, %s1050_s19, %s1051_s20  }
   0x8   :  { %1042 = dma.done.wait [#allocation3], 128  }
   0x9   :  { %1043 = vsyncadd [#allocation3], 4294967168 }
   0xa   :  { %1044 = dma.done.wait [#allocation6], 1024  }
   0xb   :  { %1045 = vsyncadd [#allocation6], 4294966272  ;;  %vm72_vm0 = vcmask 1044480   ;;  %v65_v0 = vld [vmem:[%s1419_s1 + $0x8] sm:$0x1f]  ;;  %v64_v1 = vld [vmem:[%s1419_s1] sm:$0xff] }
   0xc   :  { %913 = vmatpush.msk.msra.mxu0 %vm72_vm0, %v65_v0  ;;  %v63_v2 = vld [vmem:[#allocation2] sm:$0xff]  ;;  %vm68_vm1 = vcmask 105472   ;;  %vm96_vm2 = vcmask 261120   ;;  %s1052_s25 = smov 96   ;;  %s1053_s1 = smov 64   ;;  %v1054_v8 = vmov 32.0  }
   0xd   :  { %v1128_v3 = vld [vmem:[%s1421_s3] sm:$0x7]  ;;  %944 = vrcp.f32 %v1054_v8  ;;  %v206_v37 = vld [vmem:[%s1420_s2 + $0x58] sm:$0xff]  ;;  %v205_v39 = vld [vmem:[%s1420_s2 + $0x50] sm:$0xff]  ;;  %vm186_vm13 = vcmask 523264   ;;  %vm210_vm15 = vcmask 785408  }
   0xe   :  { %91 = vmatpush.msra.mxu0 %v64_v1  ;;  %v67_v4 = vperm.slane %v1128_v3, 0  ;;  %218 = vmatpush.msra.mxu1 %v206_v37  ;;  %v204_v41 = vld [vmem:[%s1420_s2 + $0x48] sm:$0xff]  ;;  %v203_v43 = vld [vmem:[%s1420_s2 + $0x40] sm:$0xff]  ;;  %v202_v45 = vld [vmem:[%s1420_s2 + $0x38] sm:$0xff]  ;;  %s902_s27 = sshll.u32 %s1427_s9, 4  ;;  %s903_s27 = int_to_ptr.hbm [resolvable:$true] %s902_s27 }
   0xf   :  { %914 = vmatmul.msk.f32.vlgmr.msra.gmra.mxu0 %vm68_vm1, %v63_v2  ;;  %v201_v47 = vld [vmem:[%s1420_s2 + $0x30] sm:$0xff]  ;;  %v200_v48 = vld [vmem:[%s1420_s2 + $0x28] sm:$0xff]  ;;  %v199_v49 = vld [vmem:[%s1420_s2 + $0x20] sm:$0xff] }
  0x10   :  { %219 = vmatpush.msra.mxu1 %v205_v39  ;;  %v198_v50 = vld [vmem:[%s1420_s2 + $0x18] sm:$0xff]  ;;  %v197_v51 = vld [vmem:[%s1420_s2 + $0x10] sm:$0xff]  ;;  %v196_v53 = vld [vmem:[%s1420_s2 + $0x8] sm:$0xff] }
  0x11   :  { %v195_v56 = vld [vmem:[%s1420_s2] sm:$0xff] }
  0x12   :  { %220 = vmatpush.msra.mxu1 %v204_v41 }
  0x13   :  { %v945_v9 = vpop.eup %944 }
  0x14   :  { %v101_v10 = vmul.f32 32.0, %v945_v9  ;;  %vm105_vm3 = vweird.f32 %v945_v9  ;;  %221 = vmatpush.msra.mxu1 %v203_v43 }
  0x16   :  { %v102_v11 = vsub.f32 1.0, %v101_v10  ;;  %222 = vmatpush.msra.mxu1 %v202_v45 }
  0x18   :  { %v103_v12 = vmul.f32 %v945_v9, %v102_v11  ;;  %223 = vmatpush.msra.mxu1 %v201_v47 }
  0x1a   :  { %v104_v13 = vadd.f32 %v945_v9, %v103_v12  ;;  %224 = vmatpush.msra.mxu1 %v200_v48 }
  0x1c   :  { %v1135_v16 = vsel %vm105_vm3, %v945_v9, %v104_v13  ;;  %225 = vmatpush.msra.mxu1 %v199_v49 }
  0x1e   :  { %226 = vmatpush.msra.mxu1 %v198_v50 }
  0x20   :  { %227 = vmatpush.msra.mxu1 %v197_v51 }
  0x22   :  { %228 = vmatpush.msra.mxu1 %v196_v53 }
  0x24   :  { %229 = vmatpush.msra.mxu1 %v195_v56  ;;  %v333_v56 = vld [vmem:[%s1422_s4 + $0x48] sm:$0xff] }
  0x8c   :  { %v93_v5 = vpop.f32.mrf.mxu0 }
  0x8d   :  { %v94_v6 = vadd.f32 %v93_v5, %v67_v4 }
  0x8f   :  { %127 = vrot.lane.b32.xlu0 %v94_v6, %s1052_s25  ;;  %v97_v7 = vsel %vm96_vm2, %v94_v6, 0.0 }
  0x90   :  { %98 = vadd.xlane.f32.xlu2 %v97_v7 }
  0x97   :  { %156 = vrot.lane.b32.xlu0 %v94_v6, %s1053_s1 }
 0x101   :  { %v128_v14 = vpop.permute.xlu0 %127 }
 0x102   :  { %v130_v15 = vsel %vm96_vm2, %v128_v14, 0.0 }
 0x103   :  { %131 = vadd.xlane.f32.xlu1 %v130_v15  ;;  %v99_v17 = vpop.xlane.xlu2 %98  ;;  %v188_v15 = vperm.slane %v1128_v3, 1 }
 0x104   :  { %v107_v18 = vmul.f32 %v1135_v16, %v99_v17 }
 0x106   :  { %v1138_v20 = vsub.f32 %v94_v6, %v107_v18 }
 0x108   :  { %v109_v22 = vmul.f32 %v1138_v20, %v1138_v20 }
 0x109   :  { %v157_v19 = vpop.permute.xlu0 %156 }
 0x10a   :  { %v159_v21 = vsel %vm96_vm2, %v157_v19, 0.0  ;;  %v110_v23 = vsel %vm96_vm2, %v109_v22, 0.0 }
 0x10b   :  { %160 = vadd.xlane.f32.xlu1 %v159_v21  ;;  %v190_v21 = vperm.slane %v1128_v3, 2 }
 0x113   :  { %111 = vadd.xlane.f32.xlu1 %v110_v23 }
 0x176   :  { %v132_v24 = vpop.xlane.xlu1 %131 }
 0x177   :  { %v133_v25 = vmul.f32 %v132_v24, %v1135_v16 }
 0x179   :  { %v1145_v26 = vsub.f32 %v94_v6, %v133_v25 }
 0x17b   :  { %v135_v27 = vmul.f32 %v1145_v26, %v1145_v26 }
 0x17d   :  { %137 = vrot.lane.b32.xlu2 %v135_v27, %s1052_s25 }
 0x17e   :  { %v161_v28 = vpop.xlane.xlu1 %160 }
 0x17f   :  { %v162_v29 = vmul.f32 %v161_v28, %v1135_v16 }
 0x181   :  { %v1151_v30 = vsub.f32 %v94_v6, %v162_v29 }
 0x183   :  { %v164_v31 = vmul.f32 %v1151_v30, %v1151_v30 }
 0x185   :  { %166 = vrot.lane.b32.xlu0 %v164_v31, %s1053_s1 }
 0x186   :  { %v112_v38 = vpop.xlane.xlu1 %111 }
 0x187   :  { %v113_v42 = vmul.f32 %v112_v38, %v1135_v16 }
 0x189   :  { %v114_v46 = vadd.f32 1e-05, %v113_v42 }
 0x18b   :  { %vm121_vm8 = vweird.f32 %v114_v46 }
 0x1d7   :  { %v138_v32 = vpop.permute.xlu2 %137 }
 0x1d8   :  { %v140_v33 = vsel %vm96_vm2, %v138_v32, 0.0 }
 0x1d9   :  { %141 = vadd.xlane.f32.xlu0 %v140_v33 }
 0x1f7   :  { %v167_v34 = vpop.permute.xlu0 %166 }
 0x1f8   :  { %v169_v35 = vsel %vm96_vm2, %v167_v34, 0.0 }
 0x1f9   :  { %170 = vadd.xlane.f32.xlu1 %v169_v35 }
 0x24c   :  { %v142_v36 = vpop.xlane.xlu0 %141 }
 0x24d   :  { %v143_v40 = vmul.f32 %v142_v36, %v1135_v16 }
 0x24f   :  { %v144_v44 = vadd.f32 1e-05, %v143_v40 }
 0x251   :  { %946 = vrsqrt.f32 %v144_v44  ;;  %vm151_vm6 = vweird.f32 %v144_v44 }
 0x252   :  { %948 = vrsqrt.f32 %v114_v46 }
 0x257   :  { %v947_v52 = vpop.eup %946 }
 0x258   :  { %v949_v54 = vpop.eup %948  ;;  %v146_v55 = vmul.f32 %v947_v52, %v144_v44  ;;  %vm152_vm4 = vweird.f32 %v947_v52 }
 0x259   :  { %v116_v57 = vmul.f32 %v949_v54, %v114_v46  ;;  %vm122_vm5 = vweird.f32 %v949_v54  ;;  %vm153_vm7 = vmor %vm151_vm6, %vm152_vm4 }
 0x25a   :  { %v147_v59 = vmul.f32 %v947_v52, %v146_v55  ;;  %vm123_vm9 = vmor %vm121_vm8, %vm122_vm5 }
 0x25b   :  { %v117_v61 = vmul.f32 %v949_v54, %v116_v57 }
 0x25c   :  { %v148_v63 = vmul.f32 0.5, %v147_v59  ;;  %v332_v59 = vld [vmem:[%s1422_s4 + $0x40] sm:$0xff] }
 0x25d   :  { %v118_v0 = vmul.f32 0.5, %v117_v61 }
 0x25e   :  { %v149_v1 = vsub.f32 1.5, %v148_v63  ;;  %v330_v63 = vld [vmem:[%s1422_s4 + $0x30] sm:$0xff] }
 0x25f   :  { %v119_v4 = vsub.f32 1.5, %v118_v0  ;;  %v329_v0 = vld [vmem:[%s1422_s4 + $0x28] sm:$0xff] }
 0x260   :  { %v150_v6 = vmul.f32 %v947_v52, %v149_v1  ;;  %v328_v1 = vld [vmem:[%s1422_s4 + $0x20] sm:$0xff] }
 0x261   :  { %v120_v8 = vmul.f32 %v949_v54, %v119_v4  ;;  %v326_v4 = vld [vmem:[%s1422_s4 + $0x10] sm:$0xff] }
 0x262   :  { %v154_v10 = vsel %vm153_vm7, %v947_v52, %v150_v6  ;;  %v335_v52 = vld [vmem:[%s1422_s4 + $0x58] sm:$0xff] }
 0x263   :  { %v124_v12 = vsel %vm123_vm9, %v949_v54, %v120_v8  ;;  %v155_v13 = vmul.f32 %v154_v10, %v1145_v26  ;;  %345 = vmatpush.msra.mxu2 %v335_v52  ;;  %v334_v54 = vld [vmem:[%s1422_s4 + $0x50] sm:$0xff]  ;;  %v324_v8 = vld [vmem:[%s1422_s4] sm:$0xff] }
 0x264   :  { %v125_v17 = vmul.f32 %v124_v12, %v1138_v20  ;;  %v1208_v20 = vld [vmem:[%s1421_s3 + $0x4] sm:$0x7] }
 0x265   :  { %v209_v28 = vperm.slane %v1208_v20, 0  ;;  %346 = vmatpush.msra.mxu2 %v334_v54 }
 0x266   :  { %v185_v22 = vsel %vm96_vm2, %v125_v17, %v155_v13 }
 0x267   :  { %347 = vmatpush.msra.mxu2 %v333_v56 }
 0x269   :  { %348 = vmatpush.msra.mxu2 %v332_v59 }
 0x26c   :  { %v171_v58 = vpop.xlane.xlu1 %170 }
 0x26d   :  { %v172_v60 = vmul.f32 %v171_v58, %v1135_v16 }
 0x26f   :  { %v173_v62 = vadd.f32 1e-05, %v172_v60  ;;  %v331_v60 = vld [vmem:[%s1422_s4 + $0x38] sm:$0xff] }
 0x270   :  { %349 = vmatpush.msra.mxu2 %v331_v60 }
 0x271   :  { %950 = vrsqrt.f32 %v173_v62  ;;  %vm180_vm11 = vweird.f32 %v173_v62 }
 0x272   :  { %350 = vmatpush.msra.mxu2 %v330_v63 }
 0x274   :  { %351 = vmatpush.msra.mxu2 %v329_v0  ;;  %v427_v0 = vld [vmem:[%s1423_s5 + $0x30] sm:$0xff] }
 0x276   :  { %352 = vmatpush.msra.mxu2 %v328_v1  ;;  %v426_v1 = vld [vmem:[%s1423_s5 + $0x28] sm:$0xff] }
 0x277   :  { %v951_v2 = vpop.eup %950 }
 0x278   :  { %v175_v5 = vmul.f32 %v951_v2, %v173_v62  ;;  %vm181_vm10 = vweird.f32 %v951_v2 }
 0x279   :  { %vm182_vm12 = vmor %vm180_vm11, %vm181_vm10 }
 0x27a   :  { %v176_v7 = vmul.f32 %v951_v2, %v175_v5  ;;  %v325_v5 = vld [vmem:[%s1422_s4 + $0x8] sm:$0xff] }
 0x27c   :  { %v177_v9 = vmul.f32 0.5, %v176_v7 }
 0x27e   :  { %v178_v11 = vsub.f32 1.5, %v177_v9 }
 0x280   :  { %v179_v14 = vmul.f32 %v951_v2, %v178_v11 }
 0x282   :  { %v183_v18 = vsel %vm182_vm12, %v951_v2, %v179_v14  ;;  %v327_v2 = vld [vmem:[%s1422_s4 + $0x18] sm:$0xff] }
 0x283   :  { %v184_v19 = vmul.f32 %v183_v18, %v1151_v30  ;;  %353 = vmatpush.msra.mxu2 %v327_v2  ;;  %v425_v2 = vld [vmem:[%s1423_s5 + $0x20] sm:$0xff] }
 0x285   :  { %v187_v23 = vsel %vm186_vm13, %v185_v22, %v184_v19  ;;  %354 = vmatpush.msra.mxu2 %v326_v4  ;;  %v424_v4 = vld [vmem:[%s1423_s5 + $0x18] sm:$0xff] }
 0x286   :  { %v189_v24 = vmul.f32 %v188_v15, %v187_v23 }
 0x287   :  { %355 = vmatpush.msra.mxu2 %v325_v5  ;;  %v423_v5 = vld [vmem:[%s1423_s5 + $0x10] sm:$0xff] }
 0x288   :  { %v191_v25 = vadd.f32 %v190_v21, %v189_v24 }
 0x289   :  { %356 = vmatpush.msra.mxu2 %v324_v8  ;;  %v421_v8 = vld [vmem:[%s1423_s5] sm:$0xff] }
 0x28a   :  { %vm192_vm14 = vcmp.ge.f32.partialorder %v191_v25, 0.0  ;;  %v193_v26 = vmul.f32 0.01, %v191_v25 }
 0x28c   :  { %v194_v27 = vsel %vm192_vm14, %v191_v25, %v193_v26 }
 0x28d   :  { %916 = vmatmul.msk.f32.vlgmr.msra.gmra.mxu1 %vm210_vm15, %v194_v27 }
 0x30a   :  { %v231_v3 = vpop.f32.mrf.mxu1 }
 0x30b   :  { %v232_v29 = vadd.f32 %v231_v3, %v209_v28 }
 0x30d   :  { %286 = vrot.lane.b32.xlu2 %v232_v29, %s1053_s1  ;;  %257 = vrot.lane.b32.xlu1 %v232_v29, %s1052_s25  ;;  %v234_v30 = vsel %vm96_vm2, %v232_v29, 0.0 }
 0x30e   :  { %235 = vadd.xlane.f32.xlu0 %v234_v30 }
 0x367   :  { %v287_v31 = vpop.permute.xlu2 %286 }
 0x368   :  { %v289_v32 = vsel %vm96_vm2, %v287_v31, 0.0 }
 0x369   :  { %290 = vadd.xlane.f32.xlu1 %v289_v32  ;;  %v317_v32 = vperm.slane %v1208_v20, 1 }
 0x37f   :  { %v258_v33 = vpop.permute.xlu1 %257 }
 0x380   :  { %v260_v34 = vsel %vm96_vm2, %v258_v33, 0.0 }
 0x381   :  { %261 = vadd.xlane.f32.xlu2 %v260_v34  ;;  %v236_v43 = vpop.xlane.xlu0 %235 }
 0x382   :  { %v237_v44 = vmul.f32 %v236_v43, %v1135_v16 }
 0x384   :  { %v1229_v45 = vsub.f32 %v232_v29, %v237_v44 }
 0x386   :  { %v239_v46 = vmul.f32 %v1229_v45, %v1229_v45 }
 0x388   :  { %v240_v47 = vsel %vm96_vm2, %v239_v46, 0.0 }
 0x3dc   :  { %v291_v35 = vpop.xlane.xlu1 %290 }
 0x3dd   :  { %v292_v36 = vmul.f32 %v291_v35, %v1135_v16 }
 0x3df   :  { %v1217_v37 = vsub.f32 %v232_v29, %v292_v36  ;;  %v319_v36 = vperm.slane %v1208_v20, 2 }
 0x3e1   :  { %v294_v38 = vmul.f32 %v1217_v37, %v1217_v37 }
 0x3e3   :  { %296 = vrot.lane.b32.xlu2 %v294_v38, %s1053_s1 }
 0x3f4   :  { %v262_v39 = vpop.xlane.xlu2 %261 }
 0x3f5   :  { %v263_v40 = vmul.f32 %v262_v39, %v1135_v16 }
 0x3f7   :  { %v1223_v41 = vsub.f32 %v232_v29, %v263_v40 }
 0x3f9   :  { %v265_v42 = vmul.f32 %v1223_v41, %v1223_v41 }
 0x3fb   :  { %267 = vrot.lane.b32.xlu0 %v265_v42, %s1052_s25 }
 0x425   :  { %241 = vadd.xlane.f32.xlu0 %v240_v47 }
 0x43d   :  { %v297_v48 = vpop.permute.xlu2 %296 }
 0x43e   :  { %v299_v49 = vsel %vm96_vm2, %v297_v48, 0.0 }
 0x43f   :  { %300 = vadd.xlane.f32.xlu2 %v299_v49 }
 0x46d   :  { %v268_v50 = vpop.permute.xlu0 %267 }
 0x46e   :  { %v270_v51 = vsel %vm96_vm2, %v268_v50, 0.0 }
 0x46f   :  { %271 = vadd.xlane.f32.xlu1 %v270_v51 }
 0x498   :  { %v242_v53 = vpop.xlane.xlu0 %241 }
 0x499   :  { %v243_v57 = vmul.f32 %v242_v53, %v1135_v16 }
 0x49b   :  { %v244_v61 = vadd.f32 1e-05, %v243_v57 }
 0x49d   :  { %952 = vrsqrt.f32 %v244_v61  ;;  %vm251_vm3 = vweird.f32 %v244_v61 }
 0x4a3   :  { %v953_v6 = vpop.eup %952 }
 0x4a4   :  { %v246_v9 = vmul.f32 %v953_v6, %v244_v61  ;;  %vm252_vm0 = vweird.f32 %v953_v6 }
 0x4a5   :  { %vm253_vm5 = vmor %vm251_vm3, %vm252_vm0 }
 0x4a6   :  { %v247_v14 = vmul.f32 %v953_v6, %v246_v9 }
 0x4a8   :  { %v248_v17 = vmul.f32 0.5, %v247_v14 }
 0x4aa   :  { %v249_v21 = vsub.f32 1.5, %v248_v17 }
 0x4ac   :  { %v250_v25 = vmul.f32 %v953_v6, %v249_v21 }
 0x4ae   :  { %v254_v3 = vsel %vm253_vm5, %v953_v6, %v250_v25  ;;  %v422_v6 = vld [vmem:[%s1423_s5 + $0x8] sm:$0xff] }
 0x4af   :  { %v255_v33 = vmul.f32 %v254_v3, %v1229_v45  ;;  %v1286_v45 = vld [vmem:[%s1424_s6] sm:$0x7] }
 0x4b2   :  { %v301_v55 = vpop.xlane.xlu2 %300 }
 0x4b3   :  { %v302_v58 = vmul.f32 %v301_v55, %v1135_v16 }
 0x4b5   :  { %v303_v62 = vadd.f32 1e-05, %v302_v58 }
 0x4b7   :  { %954 = vrsqrt.f32 %v303_v62  ;;  %vm310_vm6 = vweird.f32 %v303_v62 }
 0x4bd   :  { %v955_v7 = vpop.eup %954 }
 0x4be   :  { %v305_v11 = vmul.f32 %v955_v7, %v303_v62  ;;  %vm311_vm1 = vweird.f32 %v955_v7  ;;  %v428_v62 = vld [vmem:[%s1423_s5 + $0x38] sm:$0xff] }
 0x4bf   :  { %vm312_vm7 = vmor %vm310_vm6, %vm311_vm1  ;;  %443 = vmatpush.msra.mxu3 %v428_v62 }
 0x4c0   :  { %v306_v15 = vmul.f32 %v955_v7, %v305_v11 }
 0x4c1   :  { %444 = vmatpush.msra.mxu3 %v427_v0 }
 0x4c2   :  { %v307_v18 = vmul.f32 0.5, %v306_v15 }
 0x4c3   :  { %445 = vmatpush.msra.mxu3 %v426_v1 }
 0x4c4   :  { %v308_v23 = vsub.f32 1.5, %v307_v18 }
 0x4c5   :  { %446 = vmatpush.msra.mxu3 %v425_v2 }
 0x4c6   :  { %v309_v27 = vmul.f32 %v955_v7, %v308_v23 }
 0x4c7   :  { %447 = vmatpush.msra.mxu3 %v424_v4 }
 0x4c8   :  { %v313_v30 = vsel %vm312_vm7, %v955_v7, %v309_v27 }
 0x4c9   :  { %v314_v35 = vmul.f32 %v313_v30, %v1217_v37  ;;  %v337_v37 = vperm.slane %v1286_v45, 0  ;;  %448 = vmatpush.msra.mxu3 %v423_v5 }
 0x4cb   :  { %449 = vmatpush.msra.mxu3 %v422_v6 }
 0x4cd   :  { %450 = vmatpush.msra.mxu3 %v421_v8 }
 0x4e2   :  { %v272_v10 = vpop.xlane.xlu1 %271 }
 0x4e3   :  { %v273_v12 = vmul.f32 %v272_v10, %v1135_v16 }
 0x4e5   :  { %v274_v13 = vadd.f32 1e-05, %v273_v12 }
 0x4e7   :  { %956 = vrsqrt.f32 %v274_v13  ;;  %vm281_vm8 = vweird.f32 %v274_v13 }
 0x4ed   :  { %v957_v19 = vpop.eup %956 }
 0x4ee   :  { %v276_v22 = vmul.f32 %v957_v19, %v274_v13  ;;  %vm282_vm4 = vweird.f32 %v957_v19 }
 0x4ef   :  { %vm283_vm9 = vmor %vm281_vm8, %vm282_vm4 }
 0x4f0   :  { %v277_v24 = vmul.f32 %v957_v19, %v276_v22 }
 0x4f2   :  { %v278_v26 = vmul.f32 0.5, %v277_v24 }
 0x4f4   :  { %v279_v28 = vsub.f32 1.5, %v278_v26  ;;  %v414_v26 = vperm.slane %v1286_v45, 1 }
 0x4f6   :  { %v280_v29 = vmul.f32 %v957_v19, %v279_v28 }
 0x4f8   :  { %v284_v31 = vsel %vm283_vm9, %v957_v19, %v280_v29  ;;  %v416_v29 = vperm.slane %v1286_v45, 2 }
 0x4f9   :  { %v285_v34 = vmul.f32 %v284_v31, %v1223_v41 }
 0x4fb   :  { %v315_v38 = vsel %vm96_vm2, %v255_v33, %v285_v34 }
 0x4fc   :  { %v316_v39 = vsel %vm186_vm13, %v315_v38, %v314_v35  ;;  %v1330_v35 = vld [vmem:[%s1424_s6 + $0x4] sm:$0x7] }
 0x4fd   :  { %v318_v40 = vmul.f32 %v317_v32, %v316_v39 }
 0x4ff   :  { %v320_v42 = vadd.f32 %v319_v36, %v318_v40  ;;  %v431_v36 = vperm.slane %v1330_v35, 0 }
 0x501   :  { %vm321_vm10 = vcmp.ge.f32.partialorder %v320_v42, 0.0  ;;  %v322_v43 = vmul.f32 0.01, %v320_v42 }
 0x503   :  { %v323_v44 = vsel %vm321_vm10, %v320_v42, %v322_v43 }
 0x504   :  { %917 = vmatmul.msk.f32.vlgmr.msra.gmra.mxu2 %vm210_vm15, %v323_v44 }
 0x587   :  { %v358_v41 = vpop.f32.mrf.mxu2 }
 0x588   :  { %v359_v20 = vadd.f32 %v358_v41, %v337_v37 }
 0x58a   :  { %384 = vrot.lane.b32.xlu1 %v359_v20, %s1052_s25  ;;  %v361_v46 = vsel %vm96_vm2, %v359_v20, 0.0 }
 0x58b   :  { %362 = vadd.xlane.f32.xlu0 %v361_v46 }
 0x5fc   :  { %v385_v47 = vpop.permute.xlu1 %384 }
 0x5fd   :  { %v387_v48 = vsel %vm96_vm2, %v385_v47, 0.0 }
 0x5fe   :  { %388 = vadd.xlane.f32.xlu1 %v387_v48  ;;  %v363_v49 = vpop.xlane.xlu0 %362 }
 0x5ff   :  { %v364_v50 = vmul.f32 %v363_v49, %v1135_v16 }
 0x601   :  { %v365_v51 = vsub.f32 %v359_v20, %v364_v50 }
 0x603   :  { %v366_v52 = vmul.f32 %v365_v51, %v365_v51 }
 0x605   :  { %v367_v53 = vsel %vm96_vm2, %v366_v52, 0.0 }
 0x606   :  { %368 = vadd.xlane.f32.xlu2 %v367_v53 }
 0x671   :  { %v389_v54 = vpop.xlane.xlu1 %388 }
 0x672   :  { %v390_v55 = vmul.f32 %v389_v54, %v1135_v16  ;;  %v522_v54 = vld [vmem:[#allocation5 + $0x38] sm:$0xff] }
 0x673   :  { %538 = vmatpush.msrb.mxu0 %v522_v54 }
 0x674   :  { %v391_v56 = vsub.f32 %v359_v20, %v390_v55 }
 0x676   :  { %v392_v57 = vmul.f32 %v391_v56, %v391_v56 }
 0x678   :  { %394 = vrot.lane.b32.xlu0 %v392_v57, %s1052_s25  ;;  %v520_v57 = vld [vmem:[#allocation5 + $0x28] sm:$0xff] }
 0x679   :  { %v369_v60 = vpop.xlane.xlu2 %368 }
 0x67a   :  { %v370_v61 = vmul.f32 %v369_v60, %v1135_v16  ;;  %v517_v60 = vld [vmem:[#allocation5 + $0x10] sm:$0xff] }
 0x67c   :  { %v371_v63 = vadd.f32 1e-05, %v370_v61  ;;  %v516_v61 = vld [vmem:[#allocation5 + $0x8] sm:$0xff] }
 0x67e   :  { %958 = vrsqrt.f32 %v371_v63  ;;  %vm378_vm12 = vweird.f32 %v371_v63 }
 0x684   :  { %v959_v7 = vpop.eup %958 }
 0x685   :  { %v373_v9 = vmul.f32 %v959_v7, %v371_v63  ;;  %vm379_vm11 = vweird.f32 %v959_v7  ;;  %v515_v63 = vld [vmem:[#allocation5] sm:$0xff] }
 0x686   :  { %vm380_vm15 = vmor %vm378_vm12, %vm379_vm11 }
 0x687   :  { %v374_v13 = vmul.f32 %v959_v7, %v373_v9 }
 0x689   :  { %v375_v14 = vmul.f32 0.5, %v374_v13 }
 0x68b   :  { %v376_v17 = vsub.f32 1.5, %v375_v14 }
 0x68d   :  { %v377_v21 = vmul.f32 %v959_v7, %v376_v17 }
 0x68f   :  { %v381_v24 = vsel %vm380_vm15, %v959_v7, %v377_v21  ;;  %v510_v21 = vperm.slane %v1330_v35, 2 }
 0x690   :  { %v382_v28 = vmul.f32 %v381_v24, %v365_v51 }
 0x6ea   :  { %v395_v58 = vpop.permute.xlu0 %394 }
 0x6eb   :  { %v397_v59 = vsel %vm96_vm2, %v395_v58, 0.0  ;;  %v519_v58 = vld [vmem:[#allocation5 + $0x20] sm:$0xff] }
 0x6ec   :  { %398 = vadd.xlane.f32.xlu2 %v397_v59  ;;  %v518_v59 = vld [vmem:[#allocation5 + $0x18] sm:$0xff] }
 0x75f   :  { %v399_v10 = vpop.xlane.xlu2 %398 }
 0x760   :  { %v400_v11 = vmul.f32 %v399_v10, %v1135_v16 }
 0x762   :  { %v401_v12 = vadd.f32 1e-05, %v400_v11 }
 0x764   :  { %960 = vrsqrt.f32 %v401_v12  ;;  %vm408_vm0 = vweird.f32 %v401_v12 }
 0x76a   :  { %v961_v15 = vpop.eup %960 }
 0x76b   :  { %v403_v18 = vmul.f32 %v961_v15, %v401_v12  ;;  %vm409_vm14 = vweird.f32 %v961_v15 }
 0x76c   :  { %vm410_vm1 = vmor %vm408_vm0, %vm409_vm14 }
 0x76d   :  { %v404_v19 = vmul.f32 %v961_v15, %v403_v18 }
 0x76f   :  { %v405_v22 = vmul.f32 0.5, %v404_v19 }
 0x771   :  { %v406_v23 = vsub.f32 1.5, %v405_v22 }
 0x773   :  { %v407_v25 = vmul.f32 %v961_v15, %v406_v23 }
 0x775   :  { %v411_v27 = vsel %vm410_vm1, %v961_v15, %v407_v25 }
 0x776   :  { %v412_v3 = vmul.f32 %v411_v27, %v391_v56  ;;  %v521_v56 = vld [vmem:[#allocation5 + $0x30] sm:$0xff]  ;;  %v943_v27 = vld [vmem:[%s1426_s8] ss:$0 sm:$0xff]  ;;  %s1062_s8 = smov [#allocation7]  }
 0x777   :  { %539 = vmatpush.msrb.mxu0 %v521_v56  ;;  %s900_s7 = sshll.u32 %s1062_s8, 4  ;;  %s901_s7 = int_to_ptr.vmem [resolvable:$true] %s900_s7 }
 0x778   :  { %v413_v30 = vsel %vm96_vm2, %v382_v28, %v412_v3 }
 0x779   :  { %v415_v31 = vmul.f32 %v414_v26, %v413_v30  ;;  %540 = vmatpush.msrb.mxu0 %v520_v57 }
 0x77b   :  { %v417_v32 = vadd.f32 %v416_v29, %v415_v31  ;;  %541 = vmatpush.msrb.mxu0 %v519_v58  ;;  %v1057_v58 = vmov 2131351028  }
 0x77d   :  { %vm418_vm3 = vcmp.ge.f32.partialorder %v417_v32, 0.0  ;;  %v419_v33 = vmul.f32 0.01, %v417_v32  ;;  %542 = vmatpush.msrb.mxu0 %v518_v59 }
 0x77f   :  { %v420_v34 = vsel %vm418_vm3, %v417_v32, %v419_v33  ;;  %543 = vmatpush.msrb.mxu0 %v517_v60 }
 0x780   :  { %919 = vmatmul.msk.f32.vlgmr.msra.gmra.mxu3 %vm186_vm13, %v420_v34 }
 0x781   :  { %544 = vmatpush.msrb.mxu0 %v516_v61  ;;  %v1058_v61 = vmov 2102212464  }
 0x783   :  { %545 = vmatpush.msrb.mxu0 %v515_v63 }
 0x803   :  { %v452_v38 = vpop.f32.mrf.mxu3 }
 0x804   :  { %v453_v39 = vadd.f32 %v452_v38, %v431_v36 }
 0x806   :  { %478 = vrot.lane.b32.xlu2 %v453_v39, %s1052_s25  ;;  %v455_v40 = vsel %vm96_vm2, %v453_v39, 0.0 }
 0x807   :  { %456 = vadd.xlane.f32.xlu1 %v455_v40 }
 0x860   :  { %v479_v42 = vpop.permute.xlu2 %478 }
 0x861   :  { %v481_v43 = vsel %vm96_vm2, %v479_v42, 0.0 }
 0x862   :  { %482 = vadd.xlane.f32.xlu0 %v481_v43 }
 0x87a   :  { %v457_v44 = vpop.xlane.xlu1 %456 }
 0x87b   :  { %v458_v45 = vmul.f32 %v457_v44, %v1135_v16 }
 0x87d   :  { %v459_v37 = vsub.f32 %v453_v39, %v458_v45 }
 0x87f   :  { %v460_v41 = vmul.f32 %v459_v37, %v459_v37 }
 0x881   :  { %v461_v20 = vsel %vm96_vm2, %v460_v41, 0.0 }
 0x882   :  { %462 = vadd.xlane.f32.xlu2 %v461_v20 }
 0x8d5   :  { %v483_v46 = vpop.xlane.xlu0 %482 }
 0x8d6   :  { %v484_v47 = vmul.f32 %v483_v46, %v1135_v16 }
 0x8d8   :  { %v485_v48 = vsub.f32 %v453_v39, %v484_v47 }
 0x8da   :  { %v486_v49 = vmul.f32 %v485_v48, %v485_v48 }
 0x8dc   :  { %488 = vrot.lane.b32.xlu1 %v486_v49, %s1052_s25 }
 0x8f5   :  { %v463_v52 = vpop.xlane.xlu2 %462 }
 0x8f6   :  { %v464_v53 = vmul.f32 %v463_v52, %v1135_v16 }
 0x8f8   :  { %v465_v55 = vadd.f32 1e-05, %v464_v53  ;;  %v1055_v53 = vmov 683565275  }
 0x8fa   :  { %962 = vrsqrt.f32 %v465_v55  ;;  %vm472_vm5 = vweird.f32 %v465_v55 }
 0x900   :  { %v963_v62 = vpop.eup %962 }
 0x901   :  { %v467_v0 = vmul.f32 %v963_v62, %v465_v55  ;;  %vm473_vm4 = vweird.f32 %v963_v62  ;;  %v1056_v55 = vmov 2475754826  }
 0x902   :  { %vm474_vm7 = vmor %vm472_vm5, %vm473_vm4 }
 0x903   :  { %v468_v5 = vmul.f32 %v963_v62, %v467_v0  ;;  %v1059_v0 = vmov 920167782  }
 0x905   :  { %v469_v6 = vmul.f32 0.5, %v468_v5 }
 0x907   :  { %v470_v8 = vsub.f32 1.5, %v469_v6 }
 0x909   :  { %v471_v11 = vmul.f32 %v963_v62, %v470_v8 }
 0x90b   :  { %v475_v14 = vsel %vm474_vm7, %v963_v62, %v471_v11 }
 0x90c   :  { %v476_v18 = vmul.f32 %v475_v14, %v459_v37 }
 0x94e   :  { %v489_v50 = vpop.permute.xlu1 %488 }
 0x94f   :  { %v491_v51 = vsel %vm96_vm2, %v489_v50, 0.0 }
 0x950   :  { %492 = vadd.xlane.f32.xlu0 %v491_v51 }
 0x9c3   :  { %v493_v1 = vpop.xlane.xlu0 %492 }
 0x9c4   :  { %v494_v2 = vmul.f32 %v493_v1, %v1135_v16  ;;  %v508_v16 = vperm.slane %v1330_v35, 1 }
 0x9c6   :  { %v495_v4 = vadd.f32 1e-05, %v494_v2 }
 0x9c8   :  { %964 = vrsqrt.f32 %v495_v4  ;;  %vm502_vm8 = vweird.f32 %v495_v4 }
 0x9ce   :  { %v965_v7 = vpop.eup %964 }
 0x9cf   :  { %v497_v9 = vmul.f32 %v965_v7, %v495_v4  ;;  %vm503_vm6 = vweird.f32 %v965_v7  ;;  %v1060_v4 = vmov 1326507024  }
 0x9d0   :  { %vm504_vm9 = vmor %vm502_vm8, %vm503_vm6 }
 0x9d1   :  { %v498_v10 = vmul.f32 %v965_v7, %v497_v9 }
 0x9d3   :  { %v499_v12 = vmul.f32 0.5, %v498_v10 }
 0x9d5   :  { %v500_v13 = vsub.f32 1.5, %v499_v12 }
 0x9d7   :  { %v501_v15 = vmul.f32 %v965_v7, %v500_v13 }
 0x9d9   :  { %v505_v17 = vsel %vm504_vm9, %v965_v7, %v501_v15 }
 0x9da   :  { %v506_v19 = vmul.f32 %v505_v17, %v485_v48 }
 0x9dc   :  { %v507_v22 = vsel %vm96_vm2, %v476_v18, %v506_v19 }
 0x9dd   :  { %v509_v23 = vmul.f32 %v508_v16, %v507_v22 }
 0x9df   :  { %v511_v24 = vadd.f32 %v510_v21, %v509_v23 }
 0x9e1   :  { %vm512_vm10 = vcmp.ge.f32.partialorder %v511_v24, 0.0  ;;  %v513_v25 = vmul.f32 0.01, %v511_v24 }
 0x9e3   :  { %v514_v26 = vsel %vm512_vm10, %v511_v24, %v513_v25 }
 0x9e4   :  { %920 = vmatmul.msk.f32.vlgmr.msrb.gmra.mxu0 %vm186_vm13, %v514_v26 }
 0xa61   :  { %v547_v28 = vpop.f32.mrf.mxu0 }
 0xa62   :  { %v548_v3 = vadd.f32 %v943_v27, %v547_v28 }
 0xa64   :  { %v921_v29 = vmul.f32 -1.442695, %v548_v3 }
 0xa66   :  { %966 = vpow2.f32 %v921_v29 }
 0xa6c   :  { %v967_v30 = vpop.eup %966 }
 0xa6d   :  { %v553_v31 = vadd.f32 1.0, %v967_v30 }
 0xa6f   :  { %968 = vrcp.f32 %v553_v31  ;;  %v565_v35 = vand.u32 2147483648, %v553_v31  ;;  %v563_v38 = vand.u32 2147483647, %v553_v31  ;;  %vm559_vm11 = vweird.f32 %v553_v31 }
 0xa71   :  { %v566_v40 = vor.u32 1.1754944e-38, %v565_v35  ;;  %vm564_vm14 = vcmp.eq.f32.partialorder %v563_v38, 8.507059e+37 }
 0xa75   :  { %v969_v32 = vpop.eup %968 }
 0xa76   :  { %v555_v33 = vmul.f32 %v969_v32, %v553_v31  ;;  %vm560_vm2 = vweird.f32 %v969_v32 }
 0xa77   :  { %vm561_vm12 = vmor %vm559_vm11, %vm560_vm2 }
 0xa78   :  { %v556_v34 = vsub.f32 1.0, %v555_v33 }
 0xa7a   :  { %v557_v36 = vmul.f32 %v969_v32, %v556_v34 }
 0xa7c   :  { %v558_v39 = vadd.f32 %v969_v32, %v557_v36 }
 0xa7e   :  { %v562_v42 = vsel %vm561_vm12, %v969_v32, %v558_v39  ;;  %v1061_v39 = vmov 0  }
 0xa7f   :  { %v1350_v43 = vsel %vm564_vm14, %v566_v40, %v562_v42 }
 0xa80   :  { %v1353_v44 = vmul.f32 6.2831855, %v1350_v43 }
 0xa82   :  { %v573_v45 = vand.u32 2139095040, %v1353_v44  ;;  %v570_v20 = vand.u32 2147483647, %v1353_v44  ;;  %vm572_vm11 = vcmp.lt.s32.totalorder %v1353_v44, 0 }
 0xa84   :  { %v574_v37 = vshrl.u32 %v573_v45, 23  ;;  %v577_v47 = vand.u32 8388607, %v570_v20  ;;  %vm571_vm12 = vcmp.le.f32.partialorder %v570_v20, 0.7853982 }
 0xa86   :  { %v922_v41 = vadd.s32 4294967169, %v574_v37  ;;  %v578_v51 = vor.u32 8388608, %v577_v47 }
 0xa88   :  { %v580_v46 = vadd.s32 1, %v922_v41  ;;  %v1370_v11 = vshll.u32 %v578_v51, 8 }
 0xa8a   :  { %vm581_vm15 = vcmp.gt.s32.totalorder %v580_v46, 0  ;;  %v619_v21 = vand.u32 65535, %v1370_v11  ;;  %v620_v22 = vshrl.u32 %v1370_v11, 16 }
 0xa8b   :  { %v582_v48 = vsel %vm581_vm15, %v580_v46, 0 }
 0xa8c   :  { %v584_v49 = vand.u32 31, %v582_v48  ;;  %v1361_v52 = vshrl.u32 %v582_v48, 5 }
 0xa8e   :  { %v1359_v50 = vsub.s32 32, %v584_v49  ;;  %v587_v54 = vshll.u32 %v1055_v53, %v584_v49  ;;  %v590_v56 = vshll.u32 %v1056_v55, %v584_v49  ;;  %v593_v60 = vshll.u32 %v1057_v58, %v584_v49 }
 0xa8f   :  { %v596_v63 = vshll.u32 %v1058_v61, %v584_v49  ;;  %v599_v2 = vshll.u32 %v1059_v0, %v584_v49  ;;  %vm602_vm0 = vcmp.lt.s32.totalorder %v1361_v52, 1  ;;  %vm605_vm1 = vcmp.lt.s32.totalorder %v1361_v52, 4 }
 0xa90   :  { %v588_v57 = vshrl.u32 %v1056_v55, %v1359_v50  ;;  %v591_v59 = vshrl.u32 %v1057_v58, %v1359_v50  ;;  %v594_v62 = vshrl.u32 %v1058_v61, %v1359_v50  ;;  %v597_v1 = vshrl.u32 %v1059_v0, %v1359_v50 }
 0xa91   :  { %v600_v5 = vshrl.u32 %v1060_v4, %v1359_v50  ;;  %vm604_vm3 = vcmp.lt.s32.totalorder %v1361_v52, 3  ;;  %vm603_vm4 = vcmp.lt.s32.totalorder %v1361_v52, 2  ;;  %v586_v49 = vshrl.u32 %v1055_v53, %v1359_v50 }
 0xa92   :  { %v589_v6 = vor.u32 %v588_v57, %v587_v54  ;;  %v592_v7 = vor.u32 %v591_v59, %v590_v56  ;;  %v595_v8 = vor.u32 %v594_v62, %v593_v60  ;;  %v598_v9 = vor.u32 %v597_v1, %v596_v63 }
 0xa93   :  { %v601_v10 = vor.u32 %v600_v5, %v599_v2 }
 0xa94   :  { %v610_v12 = vsel %vm602_vm0, %v589_v6, %v592_v7  ;;  %v614_v13 = vsel %vm602_vm0, %v592_v7, %v595_v8  ;;  %v611_v14 = vsel %vm605_vm1, %v598_v9, 920167782  ;;  %v607_v46 = vsel %vm605_vm1, %v595_v8, 2102212464 }
 0xa95   :  { %v615_v15 = vsel %vm605_vm1, %v601_v10, 1326507024  ;;  %v612_v16 = vsel %vm604_vm3, %v595_v8, %v611_v14  ;;  %v606_v58 = vsel %vm602_vm0, %v586_v49, %v589_v6  ;;  %v608_v59 = vsel %vm604_vm3, %v592_v7, %v607_v46 }
 0xa96   :  { %v616_v17 = vsel %vm604_vm3, %v598_v9, %v615_v15  ;;  %v613_v18 = vsel %vm603_vm4, %v610_v12, %v612_v16  ;;  %v609_v50 = vsel %vm603_vm4, %v606_v58, %v608_v59 }
 0xa97   :  { %v617_v19 = vsel %vm603_vm4, %v614_v13, %v616_v17  ;;  %v643_v25 = vand.u32 65535, %v613_v18  ;;  %v644_v26 = vshrl.u32 %v613_v18, 16  ;;  %v663_v4 = vmul.u32 %v1370_v11, %v609_v50 }
 0xa98   :  { %v621_v23 = vand.u32 65535, %v617_v19  ;;  %v622_v24 = vshrl.u32 %v617_v19, 16 }
 0xa99   :  { %v646_v3 = vmul.u32 %v644_v26, %v619_v21  ;;  %v647_v29 = vmul.u32 %v643_v25, %v620_v22  ;;  %v645_v33 = vmul.u32 %v643_v25, %v619_v21  ;;  %v648_v38 = vmul.u32 %v644_v26, %v620_v22 }
 0xa9a   :  { %v624_v27 = vmul.u32 %v622_v24, %v619_v21  ;;  %v625_v28 = vmul.u32 %v621_v23, %v620_v22  ;;  %v623_v30 = vmul.u32 %v621_v23, %v619_v21  ;;  %v626_v32 = vmul.u32 %v622_v24, %v620_v22 }
 0xa9b   :  { %v649_v34 = vshll.u32 %v646_v3, 16  ;;  %v651_v42 = vshll.u32 %v647_v29, 16  ;;  %v650_v56 = vshrl.u32 %v646_v3, 16  ;;  %v652_v62 = vshrl.u32 %v647_v29, 16 }
 0xa9c   :  { %v627_v31 = vshll.u32 %v624_v27, 16  ;;  %v629_v35 = vshll.u32 %v625_v28, 16  ;;  %v628_v51 = vshrl.u32 %v624_v27, 16  ;;  %v630_v60 = vshrl.u32 %v625_v28, 16 }
 0xa9d   :  { %vm653_vm6 = vc.u32 %v645_v33, %v649_v34  ;;  %v655_v45 = vadd.s32 %v649_v34, %v645_v33 }
 0xa9e   :  { %vm631_vm5 = vc.u32 %v623_v30, %v627_v31  ;;  %v633_v36 = vadd.s32 %v627_v31, %v623_v30  ;;  %v654_v41 = vsel %vm653_vm6, 1, %v1061_v39 }
 0xa9f   :  { %v632_v40 = vsel %vm631_vm5, 1, %v1061_v39  ;;  %v656_v48 = vadd.s32 %v654_v41, %v648_v38  ;;  %vm657_vm8 = vc.u32 %v655_v45, %v651_v42  ;;  %v659_v1 = vadd.s32 %v655_v45, %v651_v42 }
 0xaa0   :  { %v634_v37 = vadd.s32 %v632_v40, %v626_v32  ;;  %vm635_vm7 = vc.u32 %v633_v36, %v629_v35  ;;  %v658_v55 = vsel %vm657_vm8, 1, %v1061_v39  ;;  %vm713_vm5 = vweird.f32 %v1353_v44 }
 0xaa1   :  { %v636_v47 = vsel %vm635_vm7, 1, %v1061_v39  ;;  %v660_v57 = vadd.s32 %v658_v55, %v656_v48 }
 0xaa2   :  { %v638_v54 = vadd.s32 %v636_v47, %v634_v37 }
 0xaa3   :  { %v661_v63 = vadd.s32 %v660_v57, %v650_v56 }
 0xaa4   :  { %v639_v61 = vadd.s32 %v638_v54, %v628_v51 }
 0xaa5   :  { %v662_v53 = vadd.s32 %v661_v63, %v652_v62 }
 0xaa6   :  { %v640_v0 = vadd.s32 %v639_v61, %v630_v60 }
 0xaa7   :  { %v666_v2 = vadd.s32 1, %v662_v53 }
 0xaa8   :  { %vm665_vm9 = vc.u32 %v640_v0, %v659_v1  ;;  %v664_v52 = vadd.s32 %v659_v1, %v640_v0 }
 0xaa9   :  { %v667_v5 = vsel %vm665_vm9, %v666_v2, %v662_v53 }
 0xaaa   :  { %v668_v8 = vadd.s32 %v667_v5, %v663_v4 }
 0xaac   :  { %v669_v6 = vadd.s32 536870912, %v668_v8 }
 0xaae   :  { %v670_v9 = vshrl.u32 %v669_v6, 30 }
 0xab0   :  { %v671_v10 = vshll.u32 %v670_v9, 30  ;;  %v694_v29 = vsub.s32 4, %v670_v9 }
 0xab2   :  { %v672_v7 = vsub.s32 %v668_v8, %v671_v10  ;;  %v695_v34 = vsel %vm572_vm11, %v694_v29, %v670_v9 }
 0xab3   :  { %v697_v38 = vsel %vm571_vm12, 0, %v695_v34 }
 0xab4   :  { %vm673_vm10 = vcmp.lt.s32.totalorder %v672_v7, 0  ;;  %v674_v12 = vsub.s32 0, %v672_v7  ;;  %v873_v37 = vadd.s32 3, %v697_v38  ;;  %v714_v48 = vand.u32 3, %v697_v38 }
 0xab6   :  { %v675_v13 = vsel %vm673_vm10, %v674_v12, %v672_v7  ;;  %v874_v49 = vand.u32 3, %v873_v37  ;;  %vm715_vm14 = vcmp.lt.s32.totalorder %v714_v48, 2  ;;  %vm716_vm15 = vcmp.eq.s32.totalorder %v714_v48, 0 }
 0xab7   :  { %v676_v14 = vclz %v675_v13  ;;  %vm719_vm4 = vcmp.eq.s32.totalorder %v714_v48, 2 }
 0xab8   :  { %vm875_vm0 = vcmp.lt.s32.totalorder %v874_v49, 2  ;;  %vm876_vm1 = vcmp.eq.s32.totalorder %v874_v49, 0  ;;  %vm879_vm3 = vcmp.eq.s32.totalorder %v874_v49, 2 }
 0xab9   :  { %v923_v15 = vadd.s32 4294967294, %v676_v14 }
 0xabb   :  { %vm924_vm2 = vcmp.lt.s32.totalorder %v923_v15, 0 }
 0xabc   :  { %v679_v16 = vsel %vm924_vm2, 0, %v923_v15 }
 0xabd   :  { %v680_v17 = vsub.s32 32, %v679_v16  ;;  %v684_v18 = vsub.s32 4294967266, %v679_v16  ;;  %v681_v19 = vshll.u32 %v672_v7, %v679_v16 }
 0xabf   :  { %v682_v21 = vshrl.u32 %v664_v52, %v680_v17  ;;  %v685_v22 = vadd.s32 127, %v684_v18 }
 0xac1   :  { %v683_v11 = vor.u32 %v682_v21, %v681_v19  ;;  %v686_v23 = vshll.u32 %v685_v22, 23 }
 0xac3   :  { %v687_v24 = vor.u32 4788187, %v686_v23  ;;  %v690_v26 = vcvt.s32.f32 %v683_v11 }
 0xac5   :  { %v688_v25 = vand.u32 2147483647, %v687_v24 }
 0xac7   :  { %v691_v27 = vmul.f32 %v690_v26, %v688_v25 }
 0xac9   :  { %v692_v28 = vxor.u32 2147483648, %v691_v27 }
 0xacb   :  { %v693_v3 = vsel %vm572_vm11, %v692_v28, %v691_v27 }
 0xacc   :  { %v696_v30 = vsel %vm571_vm12, %v1353_v44, %v693_v3 }
 0xacd   :  { %v698_v31 = vmul.f32 %v696_v30, %v696_v30 }
 0xacf   :  { %v699_v32 = vmul.f32 -0.001358992, %v698_v31  ;;  %v706_v33 = vmul.f32 -0.00019511016, %v698_v31 }
 0xad1   :  { %v700_v35 = vadd.f32 0.041655596, %v699_v32  ;;  %v707_v36 = vadd.f32 0.008332121, %v706_v33 }
 0xad3   :  { %v701_v39 = vmul.f32 %v700_v35, %v698_v31  ;;  %v708_v40 = vmul.f32 %v707_v36, %v698_v31 }
 0xad5   :  { %v702_v42 = vadd.f32 -0.4999988, %v701_v39  ;;  %v709_v45 = vadd.f32 -0.16666654, %v708_v40 }
 0xad7   :  { %v703_v41 = vmul.f32 %v702_v42, %v698_v31  ;;  %v710_v46 = vmul.f32 %v709_v45, %v698_v31 }
 0xad9   :  { %v704_v47 = vadd.f32 1.0, %v703_v41  ;;  %v711_v20 = vadd.f32 1.0, %v710_v46 }
 0xadb   :  { %v712_v51 = vmul.f32 %v711_v20, %v696_v30  ;;  %v720_v54 = vxor.u32 2147483648, %v704_v47 }
 0xadd   :  { %v717_v55 = vxor.u32 2147483648, %v712_v51  ;;  %v881_v57 = vsel %vm879_vm3, %v720_v54, %v712_v51  ;;  %v721_v59 = vsel %vm719_vm4, %v720_v54, %v712_v51 }
 0xadf   :  { %v878_v56 = vsel %vm876_vm1, %v704_v47, %v717_v55  ;;  %v718_v58 = vsel %vm716_vm15, %v704_v47, %v717_v55 }
 0xae0   :  { %v882_v60 = vsel %vm875_vm0, %v878_v56, %v881_v57  ;;  %v722_v61 = vsel %vm715_vm14, %v718_v58, %v721_v59 }
 0xae1   :  { %v883_v62 = vsel %vm713_vm5, nan, %v882_v60  ;;  %v723_v63 = vsel %vm713_vm5, nan, %v722_v61 }
 0xae2   :  { %885 = vrot.lane.b32.xlu1 %v883_v62, %s1053_s1  ;;  %725 = vrot.lane.b32.xlu0 %v723_v63, %s1053_s1 }
 0xb54   :  { %v886_v0 = vpop.permute.xlu1 %885  ;;  %v726_v50 = vpop.permute.xlu0 %725 }
 0xb55   :  { %v888_v1 = vmul.f32 %v886_v0, %v1350_v43  ;;  %v728_v44 = vmul.f32 %v726_v50, %v1350_v43 }
 0xb57   :  { %890 = vrot.lane.b32.xlu1 %v888_v1, %s1053_s1 }
 0xbc9   :  { %v891_v53 = vpop.permute.xlu1 %890 }
 0xbca   :  { %v893_v2 = vsel %vm186_vm13, %v728_v44, %v891_v53 }
 0xbcb   :  { %894 = vst [vmem:[#allocation7] sm:$0xff] %v893_v2 }
 0xbcc   :  { %905 = dma.vmem_to_hbm [thread:$0]  %s901_s7, 128, %s903_s27, [#allocation4]  }
 0xbcd   :  { %1046 = dma.done.wait [#allocation4], 128  }
 0xbce   :  { %1047 = vsyncadd [#allocation4], 4294967168 }
 0xbcf   :  { %910 = vsyncpa [#allocation3], 1 }
 0xbd0   :  { %911 = vsyncpa [#allocation6], 1 }
 0xbd1   :  { %912 = vsyncpa [#allocation4], 1 }

</bundles_post_ra>
